<compile_context>
chip_gen: v7x
topology: tpu7x:2x2x1
jax: 0.10.0
libtpu: 0.0.40
codegen_flags: <defaults>
</compile_context>

<pallas_src>
import math
import functools

import jax
import jax.numpy as jnp
from jax import lax
from jax.experimental import pallas as pl
from jax.experimental.pallas import tpu as pltpu

_VMEM_LIMIT = 48 * 1024 * 1024   # < v7x 64 MiB physical, > v5e/v6e scoped defaults
_LN_EPS = 1e-5                   # nn.LayerNorm default


def _round_up(n, m):
    return ((n + m - 1) // m) * m


def _pick_tile(n, max_tile, align=8):
    """Tile size (multiple of `align`, capped at max_tile). Callers pad n up to a
    multiple of the returned tile; avoids degenerate 8-row tiles / full-array
    fallback of the previous version."""
    if n >= max_tile:
        return max_tile
    return _round_up(n, align)


# --------------------------------------------------------------------------------------
# Fused MHA (+ residual + LayerNorm epilogue). One grid step = (batch, query tile).
# --------------------------------------------------------------------------------------
def _mha_ln_kernel(xq_ref, xkv_ref, mask_ref,
                   wq_ref, bq_ref, wk_ref, bk_ref, wv_ref, bv_ref, wo_ref, bo_ref,
                   g_ref, beta_ref, o_ref, *, num_heads, d_k, eps):
    f32 = jnp.float32
    cdt = xq_ref.dtype                 # MXU operand dtype follows the activations
    use_approx = cdt != jnp.float32    # approx reciprocal only on the bf16 fast path

    xq = xq_ref[...]                   # (tq, D)
    xkv = xkv_ref[...]                 # (Skv, D)

    # Additive mask bias, computed once (hoisted out of the head loop).
    bias = jnp.where(mask_ref[...] == 0, jnp.float32(-1e9), jnp.float32(0.0))  # (tq,Skv)

    # Fused QKV projections: MXU in cdt, accumulate in f32, bias add in f32.
    scale = 1.0 / math.sqrt(d_k)
    q = (jnp.dot(xq, wq_ref[...], preferred_element_type=f32)
         + bq_ref[...].astype(f32)) * scale
    k = jnp.dot(xkv, wk_ref[...], preferred_element_type=f32) + bk_ref[...].astype(f32)
    v = jnp.dot(xkv, wv_ref[...], preferred_element_type=f32) + bv_ref[...].astype(f32)
    q = q.astype(cdt)
    kT = k.T.astype(cdt)               # transpose K once; heads slice sublanes of kT
    v = v.astype(cdt)

    # Per-head attention accumulated straight into the output projection
    # (no jnp.concatenate / lane-masked stores).  num_heads is small & static.
    acc = jnp.zeros(o_ref.shape, f32) + bo_ref[...].astype(f32)   # (tq, D), +Wo bias once
    for h in range(num_heads):
        lo = h * d_k
        qh = q[:, lo:lo + d_k]                         # (tq, d_k)
        kh = kT[lo:lo + d_k, :]                        # (d_k, Skv)
        vh = v[:, lo:lo + d_k]                         # (Skv, d_k)
        scores = jnp.dot(qh, kh, preferred_element_type=f32) + bias
        m = jnp.max(scores, axis=-1, keepdims=True)
        e = jnp.exp(scores - m)
        s = jnp.sum(e, axis=-1, keepdims=True)
        if use_approx:
            p = e * pl.reciprocal(s, approx=True)      # EUP slot instead of VPU divide
        else:
            p = e / s
        ctx = jnp.dot(p.astype(cdt), vh, preferred_element_type=f32)        # (tq, d_k)
        acc = acc + jnp.dot(ctx.astype(cdt), wo_ref[lo:lo + d_k, :],
                            preferred_element_type=f32)

    # Fused residual-add + LayerNorm epilogue (residual xq already resident).
    y = acc + xq.astype(f32)
    mean = jnp.mean(y, axis=-1, keepdims=True)
    c = y - mean
    var = jnp.mean(c * c, axis=-1, keepdims=True)
    inv = lax.rsqrt(var + eps)
    o_ref[...] = (c * inv * g_ref[...].astype(f32)
                  + beta_ref[...].astype(f32)).astype(o_ref.dtype)


def mha_add_layernorm(xq, xkv, mask, attn_params, ln_params, num_heads,
                      *, max_q_tile=512, eps=_LN_EPS):
    B, Sq, D = xq.shape
    Skv = xkv.shape[1]
    d_k = D // num_heads
    cdt = xq.dtype

    wq, bq, wk, bk, wv, bv, wo, bo = attn_params
    wq, wk, wv, wo = (w.astype(cdt) for w in (wq, wk, wv, wo))        # weights in cdt
    bq, bk, bv, bo = (b.astype(jnp.float32) for b in (bq, bk, bv, bo))  # biases in f32
    gamma, beta = (p.astype(jnp.float32) for p in ln_params)
    xkv = xkv.astype(cdt)
    mask = jnp.asarray(mask, jnp.int32)

    # Query tiling (bounds VMEM, adds pipeline depth / megacore balance).
    tq = _pick_tile(Sq, max_q_tile)
    Sq_p = _round_up(Sq, tq)
    if Sq_p != Sq:
        xq = jnp.pad(xq, ((0, 0), (0, Sq_p - Sq), (0, 0)))
        mask = jnp.pad(mask, ((0, 0), (0, Sq_p - Sq), (0, 0)))
    n_q = Sq_p // tq

    kernel = functools.partial(_mha_ln_kernel, num_heads=num_heads, d_k=d_k, eps=eps)
    w_spec = pl.BlockSpec((D, D), lambda b, qi: (0, 0))   # resident across the grid
    r_spec = pl.BlockSpec((1, D), lambda b, qi: (0, 0))   # biases / gamma / beta

    flops = int(2 * B * n_q * (tq * D * D + 2 * Skv * D * D)   # Q,K,V projections
                + 4 * B * Sq_p * Skv * D                       # scores + probs@V
                + 2 * B * Sq_p * D * D)                        # output projection
    bytes_accessed = int(xq.nbytes + xkv.nbytes + mask.nbytes
                         + sum(a.nbytes for a in (wq, bq, wk, bk, wv, bv, wo, bo,
                                                  gamma, beta))
                         + B * Sq_p * D * xq.dtype.itemsize)
    transcendentals = int(num_heads * B * Sq_p * Skv)

    out = pl.pallas_call(
        kernel,
        out_shape=jax.ShapeDtypeStruct((B, Sq_p, D), cdt),
        grid_spec=pltpu.PrefetchScalarGridSpec(
            num_scalar_prefetch=0,
            grid=(B, n_q),
            in_specs=[
                pl.BlockSpec((None, tq, D), lambda b, qi: (b, qi, 0)),    # queries
                pl.BlockSpec((None, Skv, D), lambda b, qi: (b, 0, 0)),    # keys/values
                pl.BlockSpec((None, tq, Skv), lambda b, qi: (b, qi, 0)),  # mask (int32)
                w_spec, r_spec, w_spec, r_spec, w_spec, r_spec, w_spec, r_spec,
                r_spec, r_spec,                                           # gamma, beta
            ],
            out_specs=pl.BlockSpec((None, tq, D), lambda b, qi: (b, qi, 0)),
        ),
        compiler_params=pltpu.CompilerParams(
            dimension_semantics=("parallel", "parallel"),
            vmem_limit_bytes=_VMEM_LIMIT),
        cost_estimate=pl.CostEstimate(flops=flops, transcendentals=transcendentals,
                                      bytes_accessed=bytes_accessed),
    )(xq, xkv, mask, wq, bq, wk, bk, wv, bv, wo, bo, gamma, beta)

    return out[:, :Sq, :] if Sq_p != Sq else out


# --------------------------------------------------------------------------------------
# Fused FFN (+ residual + LayerNorm epilogue). Hidden dim F is a reduction grid axis
# with an f32 accumulator scratch, so (tr, F) intermediates never sit in VMEM at once.
# --------------------------------------------------------------------------------------
def _ffn_ln_kernel(x_ref, w1_ref, b1_ref, w2_ref, b2_ref, g_ref, beta_ref,
                   o_ref, acc_ref, *, eps):
    f32 = jnp.float32
    fi = pl.program_id(1)

    @pl.when(fi == 0)
    def _init():
        acc_ref[...] = jnp.zeros_like(acc_ref)

    x = x_ref[...]                                                    # (tr, D)
    h = jnp.dot(x, w1_ref[...], preferred_element_type=f32) + b1_ref[...].astype(f32)
    h = jnp.maximum(h, 0.0)
    acc_ref[...] += jnp.dot(h.astype(x.dtype), w2_ref[...], preferred_element_type=f32)

    @pl.when(fi == pl.num_programs(1) - 1)
    def _finalize():
        y = acc_ref[...] + b2_ref[...].astype(f32) + x.astype(f32)    # + residual
        mean = jnp.mean(y, axis=-1, keepdims=True)
        c = y - mean
        var = jnp.mean(c * c, axis=-1, keepdims=True)
        inv = lax.rsqrt(var + eps)
        o_ref[...] = (c * inv * g_ref[...].astype(f32)
                      + beta_ref[...].astype(f32)).astype(o_ref.dtype)


def ffn_add_layernorm(x, ffn_params, ln_params, *, max_row_tile=512, max_f_tile=512,
                      eps=_LN_EPS):
    B, S, D = x.shape
    cdt = x.dtype
    w1, b1, w2, b2 = ffn_params
    F = w1.shape[1]
    w1, w2 = w1.astype(cdt), w2.astype(cdt)
    b1, b2 = b1.astype(jnp.float32), b2.astype(jnp.float32)
    gamma, beta = (p.astype(jnp.float32) for p in ln_params)

    N = B * S
    xf = x.reshape(N, D)
    tr = _pick_tile(N, max_row_tile)
    Np = _round_up(N, tr)
    if Np != N:
        xf = jnp.pad(xf, ((0, Np - N), (0, 0)))

    if F <= max_f_tile:
        tf, Fp = F, F
    else:                               # F tiles must be lane-aligned (multiple of 128)
        tf = max_f_tile
        Fp = _round_up(F, tf)
        if Fp != F:
            w1 = jnp.pad(w1, ((0, 0), (0, Fp - F)))
            b1 = jnp.pad(b1, ((0, 0), (0, Fp - F)))
            w2 = jnp.pad(w2, ((0, Fp - F), (0, 0)))
    n_f = Fp // tf

    flops = int(4 * Np * D * Fp)
    bytes_accessed = int(xf.nbytes + w1.nbytes + b1.nbytes + w2.nbytes + b2.nbytes
                         + gamma.nbytes + beta.nbytes + Np * D * xf.dtype.itemsize)

    out = pl.pallas_call(
        functools.partial(_ffn_ln_kernel, eps=eps),
        out_shape=jax.ShapeDtypeStruct((Np, D), cdt),
        grid_spec=pltpu.PrefetchScalarGridSpec(
            num_scalar_prefetch=0,
            grid=(Np // tr, n_f),
            in_specs=[
                pl.BlockSpec((tr, D), lambda r, f: (r, 0)),
                pl.BlockSpec((D, tf), lambda r, f: (0, f)),
                pl.BlockSpec((1, tf), lambda r, f: (0, f)),
                pl.BlockSpec((tf, D), lambda r, f: (f, 0)),
                pl.BlockSpec((1, D), lambda r, f: (0, 0)),
                pl.BlockSpec((1, D), lambda r, f: (0, 0)),
                pl.BlockSpec((1, D), lambda r, f: (0, 0)),
            ],
            out_specs=pl.BlockSpec((tr, D), lambda r, f: (r, 0)),
            scratch_shapes=[pltpu.VMEM((tr, D), jnp.float32)],
        ),
        compiler_params=pltpu.CompilerParams(
            dimension_semantics=("parallel", "arbitrary"),
            vmem_limit_bytes=_VMEM_LIMIT),
        cost_estimate=pl.CostEstimate(flops=flops, transcendentals=0,
                                      bytes_accessed=bytes_accessed),
    )(xf, w1, b1, w2, b2, gamma, beta)

    if Np != N:
        out = out[:N]
    return out.reshape(B, S, D)


# --------------------------------------------------------------------------------------
# Full DecoderLayer forward.
# --------------------------------------------------------------------------------------
def decoder_layer_forward(x, enc_output, src_mask, tgt_mask, params):
    nh = params["num_heads"]
    x = mha_add_layernorm(x, x, tgt_mask, params["self_attn"], params["norm1"], nh)
    x = mha_add_layernorm(x, enc_output, src_mask, params["cross_attn"],
                          params["norm2"], nh)
    x = ffn_add_layernorm(x, params["ffn"], params["norm3"])
    return x


# --------------------------------------------------------------------------------------
# Pure-JAX reference (same math as the PyTorch module) for validation.
# --------------------------------------------------------------------------------------
def _ref_mha(xq, xkv, mask, params, num_heads):
    wq, bq, wk, bk, wv, bv, wo, bo = params
    B, Sq, D = xq.shape
    Skv = xkv.shape[1]
    dk = D // num_heads
    q = (xq @ wq + bq).reshape(B, Sq, num_heads, dk).transpose(0, 2, 1, 3)
    k = (xkv @ wk + bk).reshape(B, Skv, num_heads, dk).transpose(0, 2, 1, 3)
    v = (xkv @ wv + bv).reshape(B, Skv, num_heads, dk).transpose(0, 2, 1, 3)
    scores = jnp.einsum('bhqd,bhkd->bhqk', q, k) / math.sqrt(dk)
    scores = jnp.where(mask[:, None, :, :] == 0, -1e9, scores)
    probs = jax.nn.softmax(scores, axis=-1)
    o = jnp.einsum('bhqk,bhkd->bhqd', probs, v)
    o = o.transpose(0, 2, 1, 3).reshape(B, Sq, D)
    return o @ wo + bo


def _ref_ln(y, gamma, beta, eps=_LN_EPS):
    mean = jnp.mean(y, axis=-1, keepdims=True)
    var = jnp.mean((y - mean) ** 2, axis=-1, keepdims=True)
    return (y - mean) / jnp.sqrt(var + eps) * gamma + beta


def _ref_decoder_layer(x, enc, src_mask, tgt_mask, params):
    nh = params["num_heads"]
    a = _ref_mha(x, x, tgt_mask, params["self_attn"], nh)
    x = _ref_ln(x + a, *params["norm1"])
    a = _ref_mha(x, enc, src_mask, params["cross_attn"], nh)
    x = _ref_ln(x + a, *params["norm2"])
    w1, b1, w2, b2 = params["ffn"]
    f = jnp.maximum(x @ w1 + b1, 0.0) @ w2 + b2
    x = _ref_ln(x + f, *params["norm3"])
    return x


if __name__ == "__main__":
    B, S, S_src = 2, 8, 8
    d_model, num_heads, d_ff = 32, 4, 64

    key = jax.random.PRNGKey(0)
    keys = list(jax.random.split(key, 26))

    def take2():
        return keys.pop(0), keys.pop(0)

    def linear(kw, kb, din, dout, scale=0.1):
        w = jax.random.normal(kw, (din, dout), dtype=jnp.float32) * scale
        b = jax.random.normal(kb, (1, dout), dtype=jnp.float32) * scale
        return w, b

    self_attn = tuple(p for _ in range(4) for p in linear(*take2(), d_model, d_model))
    cross_attn = tuple(p for _ in range(4) for p in linear(*take2(), d_model, d_model))
    w1, b1 = linear(*take2(), d_model, d_ff)
    w2, b2 = linear(*take2(), d_ff, d_model)
    norm = (jnp.ones((1, d_model), jnp.float32), jnp.zeros((1, d_model), jnp.float32))

    params = dict(num_heads=num_heads,
                  self_attn=self_attn, cross_attn=cross_attn,
                  ffn=(w1, b1, w2, b2),
                  norm1=norm, norm2=norm, norm3=norm)

    kx, kenc = keys.pop(0), keys.pop(0)
    x = jax.random.normal(kx, (B, S, d_model), dtype=jnp.float32)
    enc = jax.random.normal(kenc, (B, S_src, d_model), dtype=jnp.float32)

    # Causal target mask, full source mask (int 0/1, matching masked_fill(mask == 0)).
    tgt_mask = jnp.tile(jnp.tril(jnp.ones((S, S), jnp.int32))[None], (B, 1, 1))
    src_mask = jnp.ones((B, S, S_src), jnp.int32)

    ref = _ref_decoder_layer(x, enc, src_mask, tgt_mask, params)

    # 1) f32 activations: strict correctness (precision follows the input dtype).
    out_f32 = decoder_layer_forward(x, enc, src_mask, tgt_mask, params)
    out_f32 = jax.block_until_ready(out_f32)
    assert out_f32.shape == (B, S, d_model)
    err_f32 = float(jnp.max(jnp.abs(out_f32 - ref)))
    assert jnp.allclose(out_f32, ref, atol=1e-4, rtol=1e-4), f"f32 mismatch: {err_f32}"

    # 2) bf16 activations + weights (MXU fast path): sanity check vs f32 reference.
    out_bf16 = decoder_layer_forward(x.astype(jnp.bfloat16), enc.astype(jnp.bfloat16),
                                     src_mask, tgt_mask, params)
    out_bf16 = jax.block_until_ready(out_bf16).astype(jnp.float32)
    err_bf16 = float(jnp.max(jnp.abs(out_bf16 - ref)))
    assert err_bf16 < 0.15, f"bf16 mismatch vs f32 reference: {err_bf16}"

    print("KERNEL_OK")
</pallas_src>

<mosaic_0001>
module attributes {stable_mosaic.version = 11 : i64} {
  func.func @_mha_ln_kernel(%arg0: i32, %arg1: i32, %arg2: memref<1x8x32xf32, #tpu.memory_space<vmem>>, %arg3: memref<1x8x32xf32, #tpu.memory_space<vmem>>, %arg4: memref<1x8x8xi32, #tpu.memory_space<vmem>>, %arg5: memref<32x32xf32, #tpu.memory_space<vmem>>, %arg6: memref<1x32xf32, #tpu.memory_space<vmem>>, %arg7: memref<32x32xf32, #tpu.memory_space<vmem>>, %arg8: memref<1x32xf32, #tpu.memory_space<vmem>>, %arg9: memref<32x32xf32, #tpu.memory_space<vmem>>, %arg10: memref<1x32xf32, #tpu.memory_space<vmem>>, %arg11: memref<32x32xf32, #tpu.memory_space<vmem>>, %arg12: memref<1x32xf32, #tpu.memory_space<vmem>>, %arg13: memref<1x32xf32, #tpu.memory_space<vmem>>, %arg14: memref<1x32xf32, #tpu.memory_space<vmem>>, %arg15: memref<1x8x32xf32, #tpu.memory_space<vmem>>) attributes {dimension_semantics = [#tpu.dimension_semantics<parallel>, #tpu.dimension_semantics<parallel>], iteration_bounds = array<i64: 2, 1>, scalar_prefetch = 0 : i64, scratch_operands = 0 : i64, tpu.core_type = #tpu.core_type<tc>, window_params = [{transform_indices = @transform_0, window_bounds = array<i64: 1, 8, 32>}, {transform_indices = @transform_1, window_bounds = array<i64: 1, 8, 32>}, {transform_indices = @transform_2, window_bounds = array<i64: 1, 8, 8>}, {pipeline_mode = #tpu.pipeline_mode<synchronous>, transform_indices = @transform_3, window_bounds = array<i64: 32, 32>}, {pipeline_mode = #tpu.pipeline_mode<synchronous>, transform_indices = @transform_4, window_bounds = array<i64: 1, 32>}, {pipeline_mode = #tpu.pipeline_mode<synchronous>, transform_indices = @transform_5, window_bounds = array<i64: 32, 32>}, {pipeline_mode = #tpu.pipeline_mode<synchronous>, transform_indices = @transform_6, window_bounds = array<i64: 1, 32>}, {pipeline_mode = #tpu.pipeline_mode<synchronous>, transform_indices = @transform_7, window_bounds = array<i64: 32, 32>}, {pipeline_mode = #tpu.pipeline_mode<synchronous>, transform_indices = @transform_8, window_bounds = array<i64: 1, 32>}, {pipeline_mode = #tpu.pipeline_mode<synchronous>, transform_indices = @transform_9, window_bounds = array<i64: 32, 32>}, {pipeline_mode = #tpu.pipeline_mode<synchronous>, transform_indices = @transform_10, window_bounds = array<i64: 1, 32>}, {pipeline_mode = #tpu.pipeline_mode<synchronous>, transform_indices = @transform_11, window_bounds = array<i64: 1, 32>}, {pipeline_mode = #tpu.pipeline_mode<synchronous>, transform_indices = @transform_12, window_bounds = array<i64: 1, 32>}, {transform_indices = @transform_13, window_bounds = array<i64: 1, 8, 32>}]} {
    %c0 = arith.constant 0 : index
    %c0_0 = arith.constant 0 : index
    %c0_1 = arith.constant 0 : index
    %0 = vector.load %arg2[%c0, %c0_0, %c0_1] : memref<1x8x32xf32, #tpu.memory_space<vmem>>, vector<1x8x32xf32>
    %1 = vector.shape_cast %0 : vector<1x8x32xf32> to vector<8x32xf32>
    %c0_2 = arith.constant 0 : index
    %c0_3 = arith.constant 0 : index
    %c0_4 = arith.constant 0 : index
    %2 = vector.load %arg3[%c0_2, %c0_3, %c0_4] : memref<1x8x32xf32, #tpu.memory_space<vmem>>, vector<1x8x32xf32>
    %3 = vector.shape_cast %2 : vector<1x8x32xf32> to vector<8x32xf32>
    %c0_5 = arith.constant 0 : index
    %c0_6 = arith.constant 0 : index
    %c0_7 = arith.constant 0 : index
    %4 = vector.load %arg4[%c0_5, %c0_6, %c0_7] : memref<1x8x8xi32, #tpu.memory_space<vmem>>, vector<1x8x8xi32>
    %5 = vector.shape_cast %4 : vector<1x8x8xi32> to vector<8x8xi32>
    %c0_i32 = arith.constant 0 : i32
    %6 = vector.broadcast %c0_i32 : i32 to vector<8x8xi32>
    %7 = arith.cmpi eq, %5, %6 : vector<8x8xi32>
    %cst = arith.constant -1.000000e+09 : f32
    %cst_8 = arith.constant 0.000000e+00 : f32
    %8 = vector.broadcast %cst : f32 to vector<8x8xf32>
    %9 = vector.broadcast %cst_8 : f32 to vector<8x8xf32>
    %10 = arith.select %7, %8, %9 : vector<8x8xi1>, vector<8x8xf32>
    %c0_9 = arith.constant 0 : index
    %c0_10 = arith.constant 0 : index
    %11 = vector.load %arg5[%c0_9, %c0_10] : memref<32x32xf32, #tpu.memory_space<vmem>>, vector<32x32xf32>
    %cst_11 = arith.constant dense<0.000000e+00> : vector<8x32xf32>
    %12 = tpu.matmul %1, %11, %cst_11 {dimension_numbers = #tpu.dot_dimension_numbers<[1], [0], [0], [1], [0, 0, 1, 1], [], []>} : vector<8x32xf32>, vector<32x32xf32>, vector<8x32xf32> -> vector<8x32xf32>
    %c0_12 = arith.constant 0 : index
    %c0_13 = arith.constant 0 : index
    %13 = vector.load %arg6[%c0_12, %c0_13] : memref<1x32xf32, #tpu.memory_space<vmem>>, vector<1x32xf32>
    %14 = vector.broadcast %13 : vector<1x32xf32> to vector<8x32xf32>
    %15 = arith.addf %12, %14 : vector<8x32xf32>
    %cst_14 = arith.constant 0.353553385 : f32
    %16 = vector.broadcast %cst_14 : f32 to vector<8x32xf32>
    %17 = arith.mulf %15, %16 : vector<8x32xf32>
    %c0_15 = arith.constant 0 : index
    %c0_16 = arith.constant 0 : index
    %18 = vector.load %arg7[%c0_15, %c0_16] : memref<32x32xf32, #tpu.memory_space<vmem>>, vector<32x32xf32>
    %cst_17 = arith.constant dense<0.000000e+00> : vector<8x32xf32>
    %19 = tpu.matmul %3, %18, %cst_17 {dimension_numbers = #tpu.dot_dimension_numbers<[1], [0], [0], [1], [0, 0, 1, 1], [], []>} : vector<8x32xf32>, vector<32x32xf32>, vector<8x32xf32> -> vector<8x32xf32>
    %c0_18 = arith.constant 0 : index
    %c0_19 = arith.constant 0 : index
    %20 = vector.load %arg8[%c0_18, %c0_19] : memref<1x32xf32, #tpu.memory_space<vmem>>, vector<1x32xf32>
    %21 = vector.broadcast %20 : vector<1x32xf32> to vector<8x32xf32>
    %22 = arith.addf %19, %21 : vector<8x32xf32>
    %c0_20 = arith.constant 0 : index
    %c0_21 = arith.constant 0 : index
    %23 = vector.load %arg9[%c0_20, %c0_21] : memref<32x32xf32, #tpu.memory_space<vmem>>, vector<32x32xf32>
    %cst_22 = arith.constant dense<0.000000e+00> : vector<8x32xf32>
    %24 = tpu.matmul %3, %23, %cst_22 {dimension_numbers = #tpu.dot_dimension_numbers<[1], [0], [0], [1], [0, 0, 1, 1], [], []>} : vector<8x32xf32>, vector<32x32xf32>, vector<8x32xf32> -> vector<8x32xf32>
    %c0_23 = arith.constant 0 : index
    %c0_24 = arith.constant 0 : index
    %25 = vector.load %arg10[%c0_23, %c0_24] : memref<1x32xf32, #tpu.memory_space<vmem>>, vector<1x32xf32>
    %26 = vector.broadcast %25 : vector<1x32xf32> to vector<8x32xf32>
    %27 = arith.addf %24, %26 : vector<8x32xf32>
    %28 = tpu.transpose %22, [1, 0] : vector<8x32xf32> -> vector<32x8xf32>
    %cst_25 = arith.constant 0.000000e+00 : f32
    %29 = vector.broadcast %cst_25 : f32 to vector<8x32xf32>
    %c0_26 = arith.constant 0 : index
    %c0_27 = arith.constant 0 : index
    %30 = vector.load %arg12[%c0_26, %c0_27] : memref<1x32xf32, #tpu.memory_space<vmem>>, vector<1x32xf32>
    %31 = vector.broadcast %30 : vector<1x32xf32> to vector<8x32xf32>
    %32 = arith.addf %29, %31 : vector<8x32xf32>
    %33 = vector.extract_strided_slice %17 {offsets = [0, 0], sizes = [8, 8], strides = [1, 1]} : vector<8x32xf32> to vector<8x8xf32>
    %34 = vector.extract_strided_slice %28 {offsets = [0, 0], sizes = [8, 8], strides = [1, 1]} : vector<32x8xf32> to vector<8x8xf32>
    %35 = vector.extract_strided_slice %27 {offsets = [0, 0], sizes = [8, 8], strides = [1, 1]} : vector<8x32xf32> to vector<8x8xf32>
    %cst_28 = arith.constant dense<0.000000e+00> : vector<8x8xf32>
    %36 = tpu.matmul %33, %34, %cst_28 {dimension_numbers = #tpu.dot_dimension_numbers<[1], [0], [0], [1], [0, 0, 1, 1], [], []>} : vector<8x8xf32>, vector<8x8xf32>, vector<8x8xf32> -> vector<8x8xf32>
    %37 = arith.addf %36, %10 : vector<8x8xf32>
    %cst_29 = arith.constant dense<0xFF800000> : vector<8xf32>
    %38 = vector.multi_reduction <maximumf>, %37, %cst_29 [1] : vector<8x8xf32> to vector<8xf32>
    %39 = vector.shape_cast %38 : vector<8xf32> to vector<8x1xf32>
    %40 = vector.broadcast %39 : vector<8x1xf32> to vector<8x8xf32>
    %41 = arith.subf %37, %40 : vector<8x8xf32>
    %42 = math.exp %41 : vector<8x8xf32>
    %cst_30 = arith.constant dense<0.000000e+00> : vector<8xf32>
    %43 = vector.multi_reduction <add>, %42, %cst_30 [1] : vector<8x8xf32> to vector<8xf32>
    %44 = vector.shape_cast %43 : vector<8xf32> to vector<8x1xf32>
    %45 = vector.broadcast %44 : vector<8x1xf32> to vector<8x8xf32>
    %46 = arith.divf %42, %45 : vector<8x8xf32>
    %cst_31 = arith.constant dense<0.000000e+00> : vector<8x8xf32>
    %47 = tpu.matmul %46, %35, %cst_31 {dimension_numbers = #tpu.dot_dimension_numbers<[1], [0], [0], [1], [0, 0, 1, 1], [], []>} : vector<8x8xf32>, vector<8x8xf32>, vector<8x8xf32> -> vector<8x8xf32>
    %c0_32 = arith.constant 0 : index
    %c0_33 = arith.constant 0 : index
    %48 = vector.load %arg11[%c0_32, %c0_33] : memref<32x32xf32, #tpu.memory_space<vmem>>, vector<8x32xf32>
    %cst_34 = arith.constant dense<0.000000e+00> : vector<8x32xf32>
    %49 = tpu.matmul %47, %48, %cst_34 {dimension_numbers = #tpu.dot_dimension_numbers<[1], [0], [0], [1], [0, 0, 1, 1], [], []>} : vector<8x8xf32>, vector<8x32xf32>, vector<8x32xf32> -> vector<8x32xf32>
    %50 = arith.addf %32, %49 : vector<8x32xf32>
    %51 = vector.extract_strided_slice %17 {offsets = [0, 8], sizes = [8, 8], strides = [1, 1]} : vector<8x32xf32> to vector<8x8xf32>
    %52 = vector.extract_strided_slice %28 {offsets = [8, 0], sizes = [8, 8], strides = [1, 1]} : vector<32x8xf32> to vector<8x8xf32>
    %53 = vector.extract_strided_slice %27 {offsets = [0, 8], sizes = [8, 8], strides = [1, 1]} : vector<8x32xf32> to vector<8x8xf32>
    %cst_35 = arith.constant dense<0.000000e+00> : vector<8x8xf32>
    %54 = tpu.matmul %51, %52, %cst_35 {dimension_numbers = #tpu.dot_dimension_numbers<[1], [0], [0], [1], [0, 0, 1, 1], [], []>} : vector<8x8xf32>, vector<8x8xf32>, vector<8x8xf32> -> vector<8x8xf32>
    %55 = arith.addf %54, %10 : vector<8x8xf32>
    %cst_36 = arith.constant dense<0xFF800000> : vector<8xf32>
    %56 = vector.multi_reduction <maximumf>, %55, %cst_36 [1] : vector<8x8xf32> to vector<8xf32>
    %57 = vector.shape_cast %56 : vector<8xf32> to vector<8x1xf32>
    %58 = vector.broadcast %57 : vector<8x1xf32> to vector<8x8xf32>
    %59 = arith.subf %55, %58 : vector<8x8xf32>
    %60 = math.exp %59 : vector<8x8xf32>
    %cst_37 = arith.constant dense<0.000000e+00> : vector<8xf32>
    %61 = vector.multi_reduction <add>, %60, %cst_37 [1] : vector<8x8xf32> to vector<8xf32>
    %62 = vector.shape_cast %61 : vector<8xf32> to vector<8x1xf32>
    %63 = vector.broadcast %62 : vector<8x1xf32> to vector<8x8xf32>
    %64 = arith.divf %60, %63 : vector<8x8xf32>
    %cst_38 = arith.constant dense<0.000000e+00> : vector<8x8xf32>
    %65 = tpu.matmul %64, %53, %cst_38 {dimension_numbers = #tpu.dot_dimension_numbers<[1], [0], [0], [1], [0, 0, 1, 1], [], []>} : vector<8x8xf32>, vector<8x8xf32>, vector<8x8xf32> -> vector<8x8xf32>
    %c8 = arith.constant 8 : index
    %c0_39 = arith.constant 0 : index
    %66 = vector.load %arg11[%c8, %c0_39] : memref<32x32xf32, #tpu.memory_space<vmem>>, vector<8x32xf32>
    %cst_40 = arith.constant dense<0.000000e+00> : vector<8x32xf32>
    %67 = tpu.matmul %65, %66, %cst_40 {dimension_numbers = #tpu.dot_dimension_numbers<[1], [0], [0], [1], [0, 0, 1, 1], [], []>} : vector<8x8xf32>, vector<8x32xf32>, vector<8x32xf32> -> vector<8x32xf32>
    %68 = arith.addf %50, %67 : vector<8x32xf32>
    %69 = vector.extract_strided_slice %17 {offsets = [0, 16], sizes = [8, 8], strides = [1, 1]} : vector<8x32xf32> to vector<8x8xf32>
    %70 = vector.extract_strided_slice %28 {offsets = [16, 0], sizes = [8, 8], strides = [1, 1]} : vector<32x8xf32> to vector<8x8xf32>
    %71 = vector.extract_strided_slice %27 {offsets = [0, 16], sizes = [8, 8], strides = [1, 1]} : vector<8x32xf32> to vector<8x8xf32>
    %cst_41 = arith.constant dense<0.000000e+00> : vector<8x8xf32>
    %72 = tpu.matmul %69, %70, %cst_41 {dimension_numbers = #tpu.dot_dimension_numbers<[1], [0], [0], [1], [0, 0, 1, 1], [], []>} : vector<8x8xf32>, vector<8x8xf32>, vector<8x8xf32> -> vector<8x8xf32>
    %73 = arith.addf %72, %10 : vector<8x8xf32>
    %cst_42 = arith.constant dense<0xFF800000> : vector<8xf32>
    %74 = vector.multi_reduction <maximumf>, %73, %cst_42 [1] : vector<8x8xf32> to vector<8xf32>
    %75 = vector.shape_cast %74 : vector<8xf32> to vector<8x1xf32>
    %76 = vector.broadcast %75 : vector<8x1xf32> to vector<8x8xf32>
    %77 = arith.subf %73, %76 : vector<8x8xf32>
    %78 = math.exp %77 : vector<8x8xf32>
    %cst_43 = arith.constant dense<0.000000e+00> : vector<8xf32>
    %79 = vector.multi_reduction <add>, %78, %cst_43 [1] : vector<8x8xf32> to vector<8xf32>
    %80 = vector.shape_cast %79 : vector<8xf32> to vector<8x1xf32>
    %81 = vector.broadcast %80 : vector<8x1xf32> to vector<8x8xf32>
    %82 = arith.divf %78, %81 : vector<8x8xf32>
    %cst_44 = arith.constant dense<0.000000e+00> : vector<8x8xf32>
    %83 = tpu.matmul %82, %71, %cst_44 {dimension_numbers = #tpu.dot_dimension_numbers<[1], [0], [0], [1], [0, 0, 1, 1], [], []>} : vector<8x8xf32>, vector<8x8xf32>, vector<8x8xf32> -> vector<8x8xf32>
    %c16 = arith.constant 16 : index
    %c0_45 = arith.constant 0 : index
    %84 = vector.load %arg11[%c16, %c0_45] : memref<32x32xf32, #tpu.memory_space<vmem>>, vector<8x32xf32>
    %cst_46 = arith.constant dense<0.000000e+00> : vector<8x32xf32>
    %85 = tpu.matmul %83, %84, %cst_46 {dimension_numbers = #tpu.dot_dimension_numbers<[1], [0], [0], [1], [0, 0, 1, 1], [], []>} : vector<8x8xf32>, vector<8x32xf32>, vector<8x32xf32> -> vector<8x32xf32>
    %86 = arith.addf %68, %85 : vector<8x32xf32>
    %87 = vector.extract_strided_slice %17 {offsets = [0, 24], sizes = [8, 8], strides = [1, 1]} : vector<8x32xf32> to vector<8x8xf32>
    %88 = vector.extract_strided_slice %28 {offsets = [24, 0], sizes = [8, 8], strides = [1, 1]} : vector<32x8xf32> to vector<8x8xf32>
    %89 = vector.extract_strided_slice %27 {offsets = [0, 24], sizes = [8, 8], strides = [1, 1]} : vector<8x32xf32> to vector<8x8xf32>
    %cst_47 = arith.constant dense<0.000000e+00> : vector<8x8xf32>
    %90 = tpu.matmul %87, %88, %cst_47 {dimension_numbers = #tpu.dot_dimension_numbers<[1], [0], [0], [1], [0, 0, 1, 1], [], []>} : vector<8x8xf32>, vector<8x8xf32>, vector<8x8xf32> -> vector<8x8xf32>
    %91 = arith.addf %90, %10 : vector<8x8xf32>
    %cst_48 = arith.constant dense<0xFF800000> : vector<8xf32>
    %92 = vector.multi_reduction <maximumf>, %91, %cst_48 [1] : vector<8x8xf32> to vector<8xf32>
    %93 = vector.shape_cast %92 : vector<8xf32> to vector<8x1xf32>
    %94 = vector.broadcast %93 : vector<8x1xf32> to vector<8x8xf32>
    %95 = arith.subf %91, %94 : vector<8x8xf32>
    %96 = math.exp %95 : vector<8x8xf32>
    %cst_49 = arith.constant dense<0.000000e+00> : vector<8xf32>
    %97 = vector.multi_reduction <add>, %96, %cst_49 [1] : vector<8x8xf32> to vector<8xf32>
    %98 = vector.shape_cast %97 : vector<8xf32> to vector<8x1xf32>
    %99 = vector.broadcast %98 : vector<8x1xf32> to vector<8x8xf32>
    %100 = arith.divf %96, %99 : vector<8x8xf32>
    %cst_50 = arith.constant dense<0.000000e+00> : vector<8x8xf32>
    %101 = tpu.matmul %100, %89, %cst_50 {dimension_numbers = #tpu.dot_dimension_numbers<[1], [0], [0], [1], [0, 0, 1, 1], [], []>} : vector<8x8xf32>, vector<8x8xf32>, vector<8x8xf32> -> vector<8x8xf32>
    %c24 = arith.constant 24 : index
    %c0_51 = arith.constant 0 : index
    %102 = vector.load %arg11[%c24, %c0_51] : memref<32x32xf32, #tpu.memory_space<vmem>>, vector<8x32xf32>
    %cst_52 = arith.constant dense<0.000000e+00> : vector<8x32xf32>
    %103 = tpu.matmul %101, %102, %cst_52 {dimension_numbers = #tpu.dot_dimension_numbers<[1], [0], [0], [1], [0, 0, 1, 1], [], []>} : vector<8x8xf32>, vector<8x32xf32>, vector<8x32xf32> -> vector<8x32xf32>
    %104 = arith.addf %86, %103 : vector<8x32xf32>
    %105 = arith.addf %104, %1 : vector<8x32xf32>
    %cst_53 = arith.constant dense<0.000000e+00> : vector<8xf32>
    %106 = vector.multi_reduction <add>, %105, %cst_53 [1] : vector<8x32xf32> to vector<8xf32>
    %107 = vector.shape_cast %106 : vector<8xf32> to vector<8x1xf32>
    %cst_54 = arith.constant 3.200000e+01 : f32
    %108 = vector.broadcast %cst_54 : f32 to vector<8x1xf32>
    %109 = arith.divf %107, %108 : vector<8x1xf32>
    %110 = vector.broadcast %109 : vector<8x1xf32> to vector<8x32xf32>
    %111 = arith.subf %105, %110 : vector<8x32xf32>
    %112 = arith.mulf %111, %111 : vector<8x32xf32>
    %cst_55 = arith.constant dense<0.000000e+00> : vector<8xf32>
    %113 = vector.multi_reduction <add>, %112, %cst_55 [1] : vector<8x32xf32> to vector<8xf32>
    %114 = vector.shape_cast %113 : vector<8xf32> to vector<8x1xf32>
    %cst_56 = arith.constant 3.200000e+01 : f32
    %115 = vector.broadcast %cst_56 : f32 to vector<8x1xf32>
    %116 = arith.divf %114, %115 : vector<8x1xf32>
    %cst_57 = arith.constant 9.99999974E-6 : f32
    %117 = vector.broadcast %cst_57 : f32 to vector<8x1xf32>
    %118 = arith.addf %116, %117 : vector<8x1xf32>
    %119 = math.rsqrt %118 : vector<8x1xf32>
    %120 = vector.broadcast %119 : vector<8x1xf32> to vector<8x32xf32>
    %121 = arith.mulf %111, %120 : vector<8x32xf32>
    %c0_58 = arith.constant 0 : index
    %c0_59 = arith.constant 0 : index
    %122 = vector.load %arg13[%c0_58, %c0_59] : memref<1x32xf32, #tpu.memory_space<vmem>>, vector<1x32xf32>
    %123 = vector.broadcast %122 : vector<1x32xf32> to vector<8x32xf32>
    %124 = arith.mulf %121, %123 : vector<8x32xf32>
    %c0_60 = arith.constant 0 : index
    %c0_61 = arith.constant 0 : index
    %125 = vector.load %arg14[%c0_60, %c0_61] : memref<1x32xf32, #tpu.memory_space<vmem>>, vector<1x32xf32>
    %126 = vector.broadcast %125 : vector<1x32xf32> to vector<8x32xf32>
    %127 = arith.addf %124, %126 : vector<8x32xf32>
    %c0_62 = arith.constant 0 : index
    %c0_63 = arith.constant 0 : index
    %c0_64 = arith.constant 0 : index
    %128 = vector.load %arg15[%c0_62, %c0_63, %c0_64] : memref<1x8x32xf32, #tpu.memory_space<vmem>>, vector<1x8x32xf32>
    %129 = vector.shape_cast %128 : vector<1x8x32xf32> to vector<8x32xf32>
    %130 = vector.shape_cast %127 : vector<8x32xf32> to vector<1x8x32xf32>
    tpu.vector_store %arg15[%c0_62, %c0_63, %c0_64], %130 {strides = array<i32>} : memref<1x8x32xf32, #tpu.memory_space<vmem>>, vector<1x8x32xf32>,
    return
  }
  func.func @transform_0(%arg0: i32, %arg1: i32) -> (i32, i32, i32) {
    %c0_i32 = arith.constant 0 : i32
    %c0_i32_0 = arith.constant 0 : i32
    return %arg0, %arg1, %c0_i32 : i32, i32, i32
  }
  func.func @transform_1(%arg0: i32, %arg1: i32) -> (i32, i32, i32) {
    %c0_i32 = arith.constant 0 : i32
    %c0_i32_0 = arith.constant 0 : i32
    %c0_i32_1 = arith.constant 0 : i32
    return %arg0, %c0_i32, %c0_i32_0 : i32, i32, i32
  }
  func.func @transform_2(%arg0: i32, %arg1: i32) -> (i32, i32, i32) {
    %c0_i32 = arith.constant 0 : i32
    %c0_i32_0 = arith.constant 0 : i32
    return %arg0, %arg1, %c0_i32 : i32, i32, i32
  }
  func.func @transform_3(%arg0: i32, %arg1: i32) -> (i32, i32) {
    %c0_i32 = arith.constant 0 : i32
    %c0_i32_0 = arith.constant 0 : i32
    %c0_i32_1 = arith.constant 0 : i32
    return %c0_i32, %c0_i32_0 : i32, i32
  }
  func.func @transform_4(%arg0: i32, %arg1: i32) -> (i32, i32) {
    %c0_i32 = arith.constant 0 : i32
    %c0_i32_0 = arith.constant 0 : i32
    %c0_i32_1 = arith.constant 0 : i32
    return %c0_i32, %c0_i32_0 : i32, i32
  }
  func.func @transform_5(%arg0: i32, %arg1: i32) -> (i32, i32) {
    %c0_i32 = arith.constant 0 : i32
    %c0_i32_0 = arith.constant 0 : i32
    %c0_i32_1 = arith.constant 0 : i32
    return %c0_i32, %c0_i32_0 : i32, i32
  }
  func.func @transform_6(%arg0: i32, %arg1: i32) -> (i32, i32) {
    %c0_i32 = arith.constant 0 : i32
    %c0_i32_0 = arith.constant 0 : i32
    %c0_i32_1 = arith.constant 0 : i32
    return %c0_i32, %c0_i32_0 : i32, i32
  }
  func.func @transform_7(%arg0: i32, %arg1: i32) -> (i32, i32) {
    %c0_i32 = arith.constant 0 : i32
    %c0_i32_0 = arith.constant 0 : i32
    %c0_i32_1 = arith.constant 0 : i32
    return %c0_i32, %c0_i32_0 : i32, i32
  }
  func.func @transform_8(%arg0: i32, %arg1: i32) -> (i32, i32) {
    %c0_i32 = arith.constant 0 : i32
    %c0_i32_0 = arith.constant 0 : i32
    %c0_i32_1 = arith.constant 0 : i32
    return %c0_i32, %c0_i32_0 : i32, i32
  }
  func.func @transform_9(%arg0: i32, %arg1: i32) -> (i32, i32) {
    %c0_i32 = arith.constant 0 : i32
    %c0_i32_0 = arith.constant 0 : i32
    %c0_i32_1 = arith.constant 0 : i32
    return %c0_i32, %c0_i32_0 : i32, i32
  }
  func.func @transform_10(%arg0: i32, %arg1: i32) -> (i32, i32) {
    %c0_i32 = arith.constant 0 : i32
    %c0_i32_0 = arith.constant 0 : i32
    %c0_i32_1 = arith.constant 0 : i32
    return %c0_i32, %c0_i32_0 : i32, i32
  }
  func.func @transform_11(%arg0: i32, %arg1: i32) -> (i32, i32) {
    %c0_i32 = arith.constant 0 : i32
    %c0_i32_0 = arith.constant 0 : i32
    %c0_i32_1 = arith.constant 0 : i32
    return %c0_i32, %c0_i32_0 : i32, i32
  }
  func.func @transform_12(%arg0: i32, %arg1: i32) -> (i32, i32) {
    %c0_i32 = arith.constant 0 : i32
    %c0_i32_0 = arith.constant 0 : i32
    %c0_i32_1 = arith.constant 0 : i32
    return %c0_i32, %c0_i32_0 : i32, i32
  }
  func.func @transform_13(%arg0: i32, %arg1: i32) -> (i32, i32, i32) {
    %c0_i32 = arith.constant 0 : i32
    %c0_i32_0 = arith.constant 0 : i32
    return %arg0, %arg1, %c0_i32 : i32, i32, i32
  }
}

</mosaic_0001>

<bundles_post_ra>
// kernel: tpu_custom_call.1
= control target key start
LH: loop header
LB: loop body
LE: loop exit
PB: predicated region body
PF: predicated region fallthrough
CT: control target
= control target key end

     0   :  { %s3277_s0 = inlined_call_operand.hbm [shape: f32[2,8,32], index: 0, kind: input, shape index: {}]   ;;  %s3278_s1 = inlined_call_operand.hbm [shape: f32[2,8,32], index: 1, kind: input, shape index: {}]   ;;  %s3279_s2 = inlined_call_operand.hbm [shape: s32[2,8,8], index: 2, kind: input, shape index: {}]   ;;  %s3280_s3 = inlined_call_operand.hbm [shape: f32[32,32], index: 3, kind: input, shape index: {}]   ;;  %s3281_s4 = inlined_call_operand.vmem [shape: f32[1,32], index: 4, kind: input, shape index: {}]   ;;  %s3282_s5 = inlined_call_operand.hbm [shape: f32[32,32], index: 5, kind: input, shape index: {}]   ;;  %s3283_s6 = inlined_call_operand.vmem [shape: f32[1,32], index: 6, kind: input, shape index: {}]   ;;  %s3284_s7 = inlined_call_operand.hbm [shape: f32[32,32], index: 7, kind: input, shape index: {}]   ;;  %s3285_s8 = inlined_call_operand.hbm [shape: f32[1,32], index: 8, kind: input, shape index: {}]   ;;  %s3286_s9 = inlined_call_operand.vmem [shape: f32[32,32], index: 9, kind: input, shape index: {}]   ;;  %s3287_s10 = inlined_call_operand.vmem [shape: f32[1,32], index: 10, kind: input, shape index: {}]   ;;  %s3288_s11 = inlined_call_operand.vmem [shape: f32[1,32], index: 11, kind: input, shape index: {}]   ;;  %s3289_s12 = inlined_call_operand.vmem [shape: f32[1,32], index: 12, kind: input, shape index: {}]   ;;  %s3290_s13 = inlined_call_operand.hbm [shape: f32[2,8,32], index: 13, kind: output, shape index: {}]  }
   0x1   :  { %3316 = sst [smem:[#allocation28_spill]] %s3278_s1 }
   0x2   :  { %3317 = sst [smem:[#allocation29_spill]] %s3280_s3 }
   0x3   :  { %3318 = sst [smem:[#allocation30_spill]] %s3284_s7 }
   0x4   :  { %3319 = sst [smem:[#allocation31_spill]] %s3286_s9 }
   0x5   :  { %3320 = sst [smem:[#allocation32_spill]] %s3287_s10 }
   0x6   :  { %3321 = sst [smem:[#allocation33_spill]] %s3288_s11 }
   0x7   :  { %3322 = sst [smem:[#allocation34_spill]] %s3289_s12 }
   0x8   :  { %3323 = sst [smem:[#allocation35_spill]] %s3290_s13 }
   0x9   :  { %18 = vsyncpa [#allocation3], 0 }
   0xa   :  { %20 = vsyncpa [#allocation3 + $0x1], 0 }
   0xb   :  { %21 = vsyncpa [#allocation6], 0 }
   0xc   :  { %23 = vsyncpa [#allocation6 + $0x1], 0 }
   0xd   :  { %24 = vsyncpa [#allocation9], 0 }
   0xe   :  { %25 = vsyncpa [#allocation12], 0 }
   0xf   :  { %26 = vsyncpa [#allocation4], 0 }
  0x10   :  { %28 = vsyncpa [#allocation4 + $0x1], 0  ;;  %s2758_s25 = smov 0   ;;  %s2760_s26 = smov 0  }
  0x11   :  { %s2762_s27 = smov 0   ;;  %s2764_s28 = smov 0  }
  0x12   :  { %s2766_s29 = smov 0   ;;  %s2768_s30 = smov 0  }
  0x13 LB: > { %3324 = sst [smem:[#allocation20_spill]] %s2650_s25  ;;  %s2789_s14 = sadd.s32 4294967295, %s2670_s30   ;;  %s2670_s30 = sphi %s2768_s30, %s34_s30   ;;  %s2666_s29 = sphi %s2766_s29, %s3374_s29   ;;  %s2662_s28 = sphi %s2764_s28, %s3373_s28   ;;  %s2658_s27 = sphi %s2762_s27, %s3377_s27   ;;  %s2654_s26 = sphi %s2760_s26, %s3376_s26   ;;  %s2650_s25 = sphi %s2758_s25, %s3375_s25  }
  0x14   : > { %3325 = sst [smem:[#allocation21_spill]] %s2662_s28  ;;  %p2035_p0 = scmp.ge.s32.totalorder %s2670_s30, 1 }
  0x15   : > { %3326 = sst [smem:[#allocation22_spill]] %s2666_s29  ;;  %p3300_p1 = scmp.eq.s32.totalorder %s2789_s14, 0 }
  0x16   : > { %3327 = sst [smem:[#allocation23_spill]] %s2670_s30  ;;  %p371_p2 = scmp.lt.s32.totalorder %s2670_s30, 3 }
  0x17   : > { %s2672_s16 = smov [#allocation8]   ;;  %s2673_s19 = smov [#allocation11]  }
  0x18   : > { %p2794_p3 = pnand %p2035_p0, %p371_p2  ;;  %s383_s17 = sshll.u32 %s2672_s16, 4  ;;  %s2798_s17 = int_to_ptr.vmem [resolvable:$true] %s383_s17 }
  0x19   : > { %s415_s20 = sshll.u32 %s2673_s19, 4  ;;  %s3330_s3 = sld [smem:[#allocation29_spill]]  ;;  %s2809_s20 = int_to_ptr.vmem [resolvable:$true] %s415_s20 }
  0x1a   : > { %s3328_s15 = scalar_select %p2794_p3, 1, 0 }
  0x1b   : > { %p2259_p4 = pneg %p2794_p3 }
  0x1d   : > { %p2805_p6 = pnand %p2259_p4, %p3300_p1 }
  0x1f   : > { %s3329_s18 = scalar_select %p2805_p6, 1, 0 }
  0x20   : > { %s2374_s23 = scalar_lea.hbm %s3330_s3, 512  ;;  %p2819_p8 = pneg %p2805_p6 }
  0x21   : > { %p2375_p7 = scmp.ne.s32.totalorder %s3330_s3, %s2374_s23  ;;  %p2381_p11 = scmp.lt.u32.totalorder %s2374_s23, %s3330_s3 }
  0x22   : > { %s3331_s13 = scalar_select %p2819_p8, 1, 0 }
  0x23   : > { %p2377_p9 = pnand %p2819_p8, %p2375_p7 }
  0x25   : > { %p2378_p10 = pneg %p2377_p9 }
  0x27   : > { %p2383_p12 = pnand %p2381_p11, %p2378_p10 }
  0x29   : > { %2386 = shalt.err (!%p2383_p12)
}
  0x2a   : > { %s2387_s21 = scalar_lea.vmem %s2798_s17, 512  ;;  %p2395_p4 = scmp.lt.s32.totalorder %s2798_s17, %s2798_s17 }
  0x2b   : > { %p2388_p13 = scmp.ne.s32.totalorder %s2798_s17, %s2387_s21  ;;  %p2396_p5 = scmp.lt.s32.totalorder %s2387_s21, %s2387_s21 }
  0x2d   : > { %p2390_p0 = pnand %p2388_p13, %p2819_p8  ;;  %p2397_p7 = por %p2396_p5, %p2395_p4 }
  0x2f   : > { %p2391_p2 = pneg %p2390_p0 }
  0x31   : > { %p2398_p9 = pnand %p2397_p7, %p2391_p2 }
  0x33   : > { %2401 = shalt.err (!%p2398_p9)
}
  0x34   : > { %s3293_s22 = smov 128   ;;  %s3294_s12 = smov 8  }
  0x35   : > { %2262 = dma.hbm_to_vmem [thread:$0]  (!%p2805_p6), %s3330_s3, 512, %s2798_s17, [#allocation9], %s3293_s22, %s3293_s22, %s3294_s12  }
  0x36   : > { %s3332_s7 = sld [smem:[#allocation30_spill]] }
  0x3c   : > { %s2402_s21 = scalar_lea.hbm %s3332_s7, 512 }
  0x3d   : > { %p2403_p5 = scmp.ne.s32.totalorder %s3332_s7, %s2402_s21  ;;  %p2409_p12 = scmp.lt.u32.totalorder %s2402_s21, %s3332_s7 }
  0x3f   : > { %p2405_p10 = pnand %p2403_p5, %p2819_p8 }
  0x41   : > { %p2406_p11 = pneg %p2405_p10 }
  0x43   : > { %p2411_p13 = pnand %p2409_p12, %p2406_p11 }
  0x45   : > { %2414 = shalt.err (!%p2411_p13)
}
  0x46   : > { %s2415_s17 = scalar_lea.vmem %s2809_s20, 512  ;;  %p2423_p7 = scmp.lt.s32.totalorder %s2809_s20, %s2809_s20 }
  0x47   : > { %p2416_p0 = scmp.ne.s32.totalorder %s2809_s20, %s2415_s17  ;;  %p2424_p9 = scmp.lt.s32.totalorder %s2415_s17, %s2415_s17 }
  0x49   : > { %p2418_p2 = pnand %p2416_p0, %p2819_p8  ;;  %p2425_p5 = por %p2424_p9, %p2423_p7 }
  0x4b   : > { %p2419_p4 = pneg %p2418_p2 }
  0x4d   : > { %p2426_p10 = pnand %p2425_p5, %p2419_p4 }
  0x4f   : > { %2429 = shalt.err (!%p2426_p10)
}
  0x50   : > { %2268 = dma.hbm_to_vmem [thread:$0]  (!%p2805_p6), %s3332_s7, 512, %s2809_s20, [#allocation12], %s3293_s22, %s3293_s22, %s3294_s12  }
  0x51   : > { %s2034_s11 = sadd.s32 4294967294, %s2670_s30   ;;  %s46_s28 = sadd.s32 1, %s2666_s29 }
  0x52   : > { %p48_p11 = scmp.ge.s32.totalorder %s46_s28, 2  ;;  %s55_s23 = sadd.s32 1, %s2658_s27 }
  0x53   : > { %p62_p12 = scmp.ne.s32.totalorder %s2658_s27, %s2654_s26  ;;  %p63_p13 = scmp.eq.s32.totalorder %s2670_s30, 0 }
  0x54   : > { %s3379_s28 = smov (%p48_p11, %s46_s28), 0  ;;  %p68_p2 = scmp.ne.s32.totalorder %s2654_s26, %s2650_s25 }
  0x55   : > { %3333 = sst [smem:[#allocation24_spill]] %s3379_s28  ;;  %p2877_p0 = por %p63_p13, %p62_p12 }
  0x56   : > { %s50_s20 = ssub.s32 %s2666_s29, %s3379_s28  ;;  %p358_p4 = scmp.eq.s32.totalorder %s2789_s14, 1 }
  0x57   : > { %p53_p7 = scmp.eq.s32.totalorder %s50_s20, 0  ;;  %p2888_p9 = por %p3300_p1, %p68_p2 }
  0x58   : > { %p2892_p5 = por %p358_p4, %p62_p12  ;;  %p364_p10 = scmp.eq.s32.totalorder %s2034_s11, 1 }
  0x59   : > { %s3335_s16 = scalar_select %p2888_p9, 1, 0 }
  0x5a   : > { %s3336_s19 = scalar_select %p2892_p5, 1, 0 }
  0x5b   : > { %s2897_s21 = scalar_select %p53_p7, %s2658_s27, %s55_s23  }
  0x5c   : > { %3337 = sst [smem:[#allocation25_spill]] %s3336_s19  ;;  %p2899_p11 = por %p364_p10, %p68_p2 }
  0x5d   : > { %3338 = sst [smem:[#allocation26_spill]] %s2897_s21  ;;  %p2290_p13 = scmp.lt.s32.totalorder %s2670_s30, 2 }
  0x5e   : > { %s3339_s17 = scalar_select %p2899_p11, 1, 0 }
  0x5f   : > { %s3295_s9 = sand.u32 1, %s2658_s27   ;;  %s2906_s10 = sshll.u32 %s2666_s29, 7 }
  0x60   : > { %3340 = sst [smem:[#allocation27_spill]] %s3339_s17  ;;  %s2910_s20 = sshll.u32 %s3295_s9, 3 }
  0x61   : > { %p2914_p12 = pnand %p2290_p13, %p2877_p0  ;;  %s471_s11 = sand.u32 1, %s2670_s30  }
  0x62   : > { %s3342_s1 = sld [smem:[#allocation28_spill]]  ;;  %s475_s7 = scalar_lea.vmem [#allocation5], %s2910_s20 }
  0x63   : > { %s3341_s22 = scalar_select %p2914_p12, 1, 0 }
  0x64   : > { %s482_s9 = sshll.u32 %s475_s7, 4  ;;  %s2928_s24 = scalar_lea.sflag [#allocation6], %s471_s11  ;;  %s2926_s9 = int_to_ptr.vmem [resolvable:$true] %s482_s9 }
  0x65   : > { %p2934_p2 = pneg %p2914_p12 }
  0x67   : > { %s3343_s29 = scalar_select %p2934_p2, 1, 0 }
  0x68   : > { %s2923_s3 = scalar_lea.hbm %s3342_s1, %s2906_s10  ;;  %s2435_s21 = scalar_lea.hbm %s3342_s1, 256 }
  0x69   : > { %s2430_s28 = scalar_lea.hbm %s2923_s3, 128  ;;  %p2436_p10 = scmp.lt.u32.totalorder %s2923_s3, %s3342_s1 }
  0x6a   : > { %p2431_p0 = scmp.ne.s32.totalorder %s2923_s3, %s2430_s28  ;;  %p2437_p13 = scmp.lt.u32.totalorder %s2435_s21, %s2430_s28 }
  0x6b   : > { %p2439_p11 = scmp.lt.u32.totalorder %s2430_s28, %s2923_s3 }
  0x6c   : > { %p2433_p4 = pnand %p2934_p2, %p2431_p0  ;;  %p2438_p1 = por %p2437_p13, %p2436_p10 }
  0x6e   : > { %p2434_p7 = pneg %p2433_p4  ;;  %p2440_p5 = por %p2439_p11, %p2438_p1 }
  0x70   : > { %p2441_p9 = pnand %p2440_p5, %p2434_p7 }
  0x72   : > { %2444 = shalt.err (!%p2441_p9)
}
  0x73   : > { %s2445_s11 = scalar_lea.vmem %s2926_s9, 128  ;;  %s2676_s12 = smov [#allocation5]  }
  0x74   : > { %p2446_p0 = scmp.ne.s32.totalorder %s2926_s9, %s2445_s11  ;;  %s2450_s23 = sshll.u32 %s2676_s12, 4  ;;  %s2451_s23 = int_to_ptr.vmem [resolvable:$false] %s2450_s23 }
  0x75   : > { %s2452_s30 = scalar_lea.vmem %s2451_s23, 256  ;;  %p2453_p6 = scmp.lt.s32.totalorder %s2926_s9, %s2451_s23 }
  0x76   : > { %p2448_p4 = pnand %p2446_p0, %p2934_p2  ;;  %p2454_p8 = scmp.lt.s32.totalorder %s2452_s30, %s2445_s11 }
  0x78   : > { %p2449_p3 = pneg %p2448_p4  ;;  %p2455_p10 = por %p2454_p8, %p2453_p6 }
  0x7a   : > { %p2456_p13 = pnand %p2455_p10, %p2449_p3 }
  0x7c   : > { %2459 = shalt.err (!%p2456_p13)
}
  0x7d   : > { %2278 = dma.hbm_to_vmem [thread:$0]  (!%p2914_p12), %s2923_s3, 128, %s2926_s9, %s2928_s24  }
  0x7e   : > { %s2677_s28 = smov [#allocation10]   ;;  %s2678_s7 = smov [#allocation13]  }
  0x7f   : > { %s399_s21 = sshll.u32 %s2677_s28, 4  ;;  %s429_s1 = sshll.u32 %s2678_s7, 4  ;;  %s400_s21 = int_to_ptr.vmem [resolvable:$true] %s399_s21  ;;  %s430_s1 = int_to_ptr.vmem [resolvable:$true] %s429_s1 }
  0x80   : > { %s2460_s23 = scalar_lea.hbm %s3282_s5, 512  ;;  %p3344_p3 = scmp.ne.s32.totalorder %s3331_s13, 0 }
  0x81   : > { %p2461_p1 = scmp.ne.s32.totalorder %s3282_s5, %s2460_s23  ;;  %p2467_p9 = scmp.lt.u32.totalorder %s2460_s23, %s3282_s5 }
  0x83   : > { %p2463_p6 = pnand %p2461_p1, %p3344_p3 }
  0x85   : > { %p2464_p8 = pneg %p2463_p6 }
  0x87   : > { %p2469_p5 = pnand %p2467_p9, %p2464_p8 }
  0x89   : > { %2472 = shalt.err (!%p2469_p5)
}
  0x8a   : > { %s2473_s3 = scalar_lea.vmem %s400_s21, 512  ;;  %p2481_p4 = scmp.lt.s32.totalorder %s400_s21, %s400_s21 }
  0x8b   : > { %p2474_p11 = scmp.ne.s32.totalorder %s400_s21, %s2473_s3  ;;  %p2482_p10 = scmp.lt.s32.totalorder %s2473_s3, %s2473_s3 }
  0x8d   : > { %p2476_p7 = pnand %p2474_p11, %p3344_p3  ;;  %p2483_p13 = por %p2482_p10, %p2481_p4 }
  0x8f   : > { %p2477_p0 = pneg %p2476_p7 }
  0x91   : > { %p2484_p12 = pnand %p2483_p13, %p2477_p0 }
  0x93   : > { %2487 = shalt.err (!%p2484_p12)
}
  0x94   : > { %p3345_p1 = scmp.ne.s32.totalorder %s3329_s18, 0  ;;  %s3346_s17 = smov 8  }
  0x95   : > { %s3347_s9 = smov 128   ;;  %s2488_s12 = scalar_lea.hbm %s3285_s8, 16 }
  0x96   : > { %2265 = dma.hbm_to_vmem [thread:$0]  (!%p3345_p1), %s3282_s5, 512, %s400_s21, [#allocation9], %s3347_s9, %s3347_s9, %s3346_s17  }
  0x97   : > { %p2489_p6 = scmp.ne.s32.totalorder %s3285_s8, %s2488_s12  ;;  %p2495_p9 = scmp.lt.u32.totalorder %s2488_s12, %s3285_s8 }
  0x99   : > { %p2491_p12 = pnand %p2489_p6, %p3344_p3 }
  0x9b   : > { %p2492_p8 = pneg %p2491_p12 }
  0x9d   : > { %p2497_p5 = pnand %p2495_p9, %p2492_p8 }
  0x9f   : > { %2500 = shalt.err (!%p2497_p5)
}
  0xa0   : > { %s2501_s25 = scalar_lea.vmem %s430_s1, 16  ;;  %s2508_s21 = scalar_lea.vmem %s430_s1, 32 }
  0xa1   : > { %p2502_p11 = scmp.ne.s32.totalorder %s430_s1, %s2501_s25  ;;  %p2509_p4 = scmp.lt.s32.totalorder %s430_s1, %s430_s1 }
  0xa2   : > { %p2510_p10 = scmp.lt.s32.totalorder %s2508_s21, %s2501_s25 }
  0xa3   : > { %p2504_p7 = pnand %p2502_p11, %p3344_p3 }
  0xa4   : > { %p2511_p13 = por %p2510_p10, %p2509_p4 }
  0xa5   : > { %p2505_p0 = pneg %p2504_p7 }
  0xa7   : > { %p2512_p2 = pnand %p2511_p13, %p2505_p0 }
  0xa9   : > { %2515 = shalt.err (!%p2512_p2)
}
  0xaa   : > { %2271 = dma.hbm_to_vmem [thread:$0]  (!%p3345_p1), %s3285_s8, 16, %s430_s1, [#allocation12]  }
  0xab   : > { %s3001_s28 = scalar_lea.hbm %s3277_s0, %s2906_s10  ;;  %s456_s7 = scalar_lea.vmem [#allocation2], %s2910_s20 }
  0xac   : > { %s464_s18 = sshll.u32 %s456_s7, 4  ;;  %s3010_s11 = scalar_lea.hbm %s3279_s2, %s2906_s10  ;;  %s3004_s18 = int_to_ptr.vmem [resolvable:$true] %s464_s18 }
  0xad   : > { %s3348_s30 = sand.u32 1, %s2658_s27   ;;  %s2516_s3 = scalar_lea.hbm %s3001_s28, 128 }
  0xae   : > { %s453_s1 = scalar_lea.sflag [#allocation3], %s3348_s30  ;;  %p2517_p2 = scmp.ne.s32.totalorder %s3001_s28, %s2516_s3 }
  0xaf   : > { %p3349_p3 = scmp.ne.s32.totalorder %s3343_s29, 0  ;;  %s2521_s17 = scalar_lea.hbm %s3277_s0, 256 }
  0xb0   : > { %p2522_p12 = scmp.lt.u32.totalorder %s3001_s28, %s3277_s0  ;;  %p2523_p8 = scmp.lt.u32.totalorder %s2521_s17, %s2516_s3 }
  0xb1   : > { %p2519_p1 = pnand %p2517_p2, %p3349_p3  ;;  %p2525_p5 = scmp.lt.u32.totalorder %s2516_s3, %s3001_s28 }
  0xb2   : > { %p2524_p9 = por %p2523_p8, %p2522_p12 }
  0xb3   : > { %p2520_p6 = pneg %p2519_p1 }
  0xb4   : > { %p2526_p11 = por %p2525_p5, %p2524_p9 }
  0xb6   : > { %p2527_p7 = pnand %p2526_p11, %p2520_p6 }
  0xb8   : > { %2530 = shalt.err (!%p2527_p7)
}
  0xb9   : > { %s2531_s10 = scalar_lea.vmem %s3004_s18, 128  ;;  %s2679_s19 = smov [#allocation2]  }
  0xba   : > { %p2532_p0 = scmp.ne.s32.totalorder %s3004_s18, %s2531_s10  ;;  %s2536_s7 = sshll.u32 %s2679_s19, 4  ;;  %s2537_s7 = int_to_ptr.vmem [resolvable:$false] %s2536_s7 }
  0xbb   : > { %s2538_s12 = scalar_lea.vmem %s2537_s7, 256  ;;  %p2539_p13 = scmp.lt.s32.totalorder %s3004_s18, %s2537_s7 }
  0xbc   : > { %p2534_p4 = pnand %p2532_p0, %p3349_p3  ;;  %p2540_p2 = scmp.lt.s32.totalorder %s2538_s12, %s2531_s10 }
  0xbe   : > { %p2535_p10 = pneg %p2534_p4  ;;  %p2541_p1 = por %p2540_p2, %p2539_p13 }
  0xc0   : > { %p2542_p12 = pnand %p2541_p1, %p2535_p10 }
  0xc2   : > { %2545 = shalt.err (!%p2542_p12)
}
  0xc3   : > { %p3350_p6 = scmp.ne.s32.totalorder %s3341_s22, 0  ;;  %s493_s23 = scalar_lea.vmem [#allocation7], %s2910_s20 }
  0xc4   : > { %s501_s30 = sshll.u32 %s493_s23, 4  ;;  %s2546_s3 = scalar_lea.hbm %s3010_s11, 128  ;;  %s502_s30 = int_to_ptr.vmem [resolvable:$true] %s501_s30 }
  0xc5   : > { %2275 = dma.hbm_to_vmem [thread:$0]  (!%p3350_p6), %s3001_s28, 128, %s3004_s18, %s453_s1  }
  0xc6   : > { %p2547_p8 = scmp.ne.s32.totalorder %s3010_s11, %s2546_s3  ;;  %s2551_s17 = scalar_lea.hbm %s3279_s2, 256 }
  0xc7   : > { %p2552_p11 = scmp.lt.u32.totalorder %s3010_s11, %s3279_s2  ;;  %p2553_p7 = scmp.lt.u32.totalorder %s2551_s17, %s2546_s3 }
  0xc8   : > { %p2549_p9 = pnand %p2547_p8, %p3349_p3  ;;  %p2555_p4 = scmp.lt.u32.totalorder %s2546_s3, %s3010_s11 }
  0xc9   : > { %p2554_p0 = por %p2553_p7, %p2552_p11 }
  0xca   : > { %p2550_p5 = pneg %p2549_p9 }
  0xcb   : > { %p2556_p10 = por %p2555_p4, %p2554_p0 }
  0xcd   : > { %p2557_p13 = pnand %p2556_p10, %p2550_p5 }
  0xcf   : > { %2560 = shalt.err (!%p2557_p13)
}
  0xd0   : > { %s2561_s20 = scalar_lea.vmem %s502_s30, 128  ;;  %s2680_s28 = smov [#allocation7]  }
  0xd1   : > { %p2562_p2 = scmp.ne.s32.totalorder %s502_s30, %s2561_s20  ;;  %s2566_s18 = sshll.u32 %s2680_s28, 4  ;;  %s2567_s18 = int_to_ptr.vmem [resolvable:$false] %s2566_s18 }
  0xd2   : > { %s2568_s1 = scalar_lea.vmem %s2567_s18, 256  ;;  %p2569_p8 = scmp.lt.s32.totalorder %s502_s30, %s2567_s18 }
  0xd3   : > { %p2564_p1 = pnand %p2562_p2, %p3349_p3  ;;  %p2570_p9 = scmp.lt.s32.totalorder %s2568_s1, %s2561_s20 }
  0xd5   : > { %p2565_p12 = pneg %p2564_p1  ;;  %p2571_p6 = por %p2570_p9, %p2569_p8 }
  0xd7   : > { %p2572_p7 = pnand %p2571_p6, %p2565_p12 }
  0xd9   : > { %2575 = shalt.err (!%p2572_p7)
}
  0xda   : > { %p3351_p11 = scmp.ne.s32.totalorder %s3341_s22, 0  ;;  %p3352_p5 = scmp.ne.s32.totalorder %s3328_s15, 0 }
  0xdb   : > { %s3057_s29 = sand.u32 (!%p3352_p5), 1, %s2654_s26   ;;  %p3353_p3 = scmp.ne.s32.totalorder (!%p3352_p5), %s3335_s16, 0 }
  0xdc   : > { %2281 = dma.hbm_to_vmem [thread:$0]  (!%p3351_p11), %s3010_s11, 128, %s502_s30, %s2928_s24  }
  0xdd   : > { %510 = sbr.rel (%p3352_p5) target bundleno = 3346 (0xd12), region = 72  ;;  %s3060_s10 = sshll.u32 (!%p3352_p5), %s3057_s29, 3 }
  0xde   : > { %s513_s19 = scalar_lea.sflag (!%p3352_p5), [#allocation3], %s3057_s29  ;;  %s516_s7 = scalar_lea.vmem (!%p3352_p5), [#allocation2], %s3060_s10 }
  0xe4   : > { %2629 = dma.done.wait (%p3353_p3), %s513_s19, 128  }
  0xe5   : > { %2631 = vsyncadd (%p3353_p3), %s513_s19, 4294967168  ;;  %s521_s15 = sand.u32 1, %s2789_s14   ;;  %s525_s24 = scalar_lea.vmem [#allocation5], %s3060_s10 }
  0xe6   : > { %s522_s22 = scalar_lea.sflag [#allocation6], %s521_s15 }
  0xe7   : > { %2633 = dma.done.wait (%p3353_p3), %s522_s22, 256  }
  0xe8   : > { %2635 = vsyncadd (%p3353_p3), %s522_s22, 4294967040  ;;  %s534_s11 = scalar_lea.vmem [#allocation7], %s3060_s10  ;;  %p3354_p6 = scmp.eq.s32.totalorder %s2789_s14, 0 }
  0xea   : > { %2637 = dma.done.wait (%p3354_p6), [#allocation9], 1024   ;;  %p3355_p0 = pmov %p3354_p6 }
  0xec   : > { %2639 = vsyncadd (%p3355_p0), [#allocation9], 4294966272  ;;  %p3356_p4 = pmov %p3355_p0 }
  0xed   : > { %p3357_p10 = pmov %p3355_p0 }
  0xee   : > { %2641 = dma.done.wait (%p3356_p4), [#allocation12], 528  }
  0xef   : > { %2643 = vsyncadd (%p3357_p10), [#allocation12], 4294966768  ;;  %v2681_v0 = vmov 0.0|0.0   ;;  %vm2682_vm0 = vmmov 0   ;;  %v2683_v1 = vmov 0.0   ;;  %v694_v2 = vld [vmem:[#allocation10] sm:$0xff] }
  0xf0   : > { %2223 = vmatprep.subr.bf16.mxu1 %v2681_v0  ;;  %2217 = vmatprep.subr.bf16.mxu0 %v2681_v0  ;;  %v695_v3 = vld [vmem:[#allocation10 + $0x8] sm:$0xff]  ;;  %v608_v4 = vld [vmem:[#allocation8] sm:$0xff]  ;;  %v696_v7 = vld [vmem:[#allocation10 + $0x10] sm:$0xff]  ;;  %vm619_vm1 = vcmask 261120   ;;  %vm867_vm2 = vcmask 64512   ;;  %s2684_s30 = smov 120  }
  0xf1   : > { %2143 = vmatprep.mubr.msk.f32.mxu1 %vm2682_vm0, %v2683_v1  ;;  %2132 = vmatprep.mubr.msk.f32.mxu0 %vm2682_vm0, %v2683_v1  ;;  %v2224_v5 = vpack.c.bf16 %v695_v3, %v694_v2  ;;  %v609_v6 = vld [vmem:[#allocation8 + $0x8] sm:$0xff]  ;;  %v697_v8 = vld [vmem:[#allocation10 + $0x18] sm:$0xff]  ;;  %v610_v10 = vld [vmem:[#allocation8 + $0x10] sm:$0xff]  ;;  %s3358_s21 = sld [smem:[#allocation31_spill]]  ;;  %s2685_s17 = smov 112  }
  0xf2   : > { %v2218_v9 = vpack.c.bf16 %v609_v6, %v608_v4  ;;  %v611_v11 = vld [vmem:[#allocation8 + $0x18] sm:$0xff]  ;;  %v2227_v12 = vpack.c.bf16 %v697_v8, %v696_v7  ;;  %v604_v14 = vld [vmem:[%s525_s24] sm:$0xff]  ;;  %v2058_v16 = vld [vmem:[%s3283_s6] ss:$0 sm:$0xff]  ;;  %s2686_s9 = smov 104   ;;  %s3359_s1 = sld [smem:[#allocation32_spill]] }
  0xf3   : > { %2225 = vmatpush3.bf16.msra.mxu1 %v2224_v5  ;;  %v2221_v13 = vpack.c.bf16 %v611_v11, %v610_v10  ;;  %v3091_v15 = vld [vmem:[%s516_s7] sm:$0xff]  ;;  %v778_v25 = vld [vmem:[#allocation11] sm:$0xff]  ;;  %v779_v26 = vld [vmem:[#allocation11 + $0x8] sm:$0xff]  ;;  %s3360_s24 = sld [smem:[#allocation21_spill]]  ;;  %s3362_s12 = sld [smem:[#allocation33_spill]] }
  0xf4   : > { %2219 = vmatpush3.bf16.msra.mxu0 %v2218_v9  ;;  %2226 = vmatprep.subr.bf16.mxu1 %v2681_v0  ;;  %v2056_v17 = vld [vmem:[%s3281_s4] ss:$0 sm:$0xff]  ;;  %v2230_v28 = vpack.c.bf16 %v779_v26, %v778_v25  ;;  %v781_v29 = vld [vmem:[#allocation11 + $0x18] sm:$0xff]  ;;  %v2060_v42 = vld [vmem:[#allocation13] ss:$0 sm:$0xff]  ;;  %s3363_s3 = sld [smem:[#allocation34_spill]] }
  0xf5   : > { %2220 = vmatprep.subr.bf16.mxu0 %v2681_v0  ;;  %v780_v27 = vld [vmem:[#allocation11 + $0x10] sm:$0xff]  ;;  %s3364_s28 = sld [smem:[#allocation35_spill]]  ;;  %s1857_s19 = scalar_lea.sflag [#allocation4], %s3057_s29 }
  0xf6   : > { %v2233_v30 = vpack.c.bf16 %v781_v29, %v780_v27  ;;  %v605_v31 = vld [vmem:[%s534_s11] sm:$0xff]  ;;  %s3361_s11 = sld [smem:[#allocation25_spill]] }
  0xf7   : > { %2228 = vmatpush3.bf16.msra.mxu1 %v2227_v12  ;;  %vm606_vm3 = vcmp.eq.s32.totalorder %v605_v31, 0  ;;  %v1028_v51 = vld [vmem:[%s3358_s21] sm:$0xff] }
  0xf8   : > { %2222 = vmatpush3.bf16.msra.mxu0 %v2221_v13  ;;  %2157 = vmatprep.subr.mxu1 %v2683_v1  ;;  %v3129_v32 = vsel %vm606_vm3, -1e+09, %v2683_v1 }
  0xf9   : > { %2229 = vmatprep.subr.bf16.mxu0 %v2681_v0  ;;  %s2082_s25 = sshll.u32 %s3360_s24, 7 }
  0xfa   : > { %2144 = vmatmul.mubr.msk.f32.vlgmr.msra.gmra.mrb[0].mxu1 %vm619_vm1, %v604_v14 }
  0xfb   : > { %2133 = vmatmul.mubr.msk.f32.vlgmr.msra.gmra.mrb[0].mxu0 %vm619_vm1, %v3091_v15  ;;  %2159 = vmatprep.mubr.msk.f32.mxu1 %vm2682_vm0, %v2683_v1  ;;  %s3365_s18 = smov %s3364_s28 }
  0xfc   : > { %2154 = vmatprep.mubr.msk.f32.mxu0 %vm2682_vm0, %v2683_v1  ;;  %2231 = vmatpush3.bf16.msra.mxu0 %v2230_v28  ;;  %p3366_p2 = scmp.ne.s32.totalorder %s3361_s11, 0 }
  0xfd   : > { %2232 = vmatprep.subr.bf16.mxu0 %v2681_v0  ;;  %v1269_v0 = vld [vmem:[%s3358_s21 + $0x8] sm:$0xff] }
 0x100   : > { %2234 = vmatpush3.bf16.msra.mxu0 %v2233_v30 }
 0x101   : > { %2167 = vmatprep.subr.mxu0 %v2683_v1 }
 0x103   : > { %2155 = vmatmul.mubr.msk.f32.vlgmr.msra.gmra.mrb[2].mxu0 %vm619_vm1, %v604_v14 }
 0x104   : > { %2169 = vmatprep.mubr.msk.f32.mxu0 %vm2682_vm0, %v2683_v1  ;;  %2168 = vmatpush3.msra.mxu0 %v1028_v51 }
 0x105   : > { %2177 = vmatprep.subr.mxu0 %v2683_v1 }
 0x1cd   : > { %v774_v18 = vpop.f32.mrb[0].mxu1 }
 0x1ce   : > { %v3107_v19 = vadd.f32 %v2058_v16, %v774_v18  ;;  %v689_v20 = vpop.f32.mrb[0].mxu0  ;;  %v2145_v21 = vpop.f32.mrb[1].mxu1 }
 0x1cf   : > { %v690_v22 = vadd.f32 %v2056_v17, %v689_v20  ;;  %v2134_v23 = vpop.f32.mrb[1].mxu0 }
 0x1d0   : > { %1105 = vrot.lane.b32.xlu1 %v3107_v19, %s2684_s30  ;;  %2158 = vmatpush3.xpose.msk.msra.mxu1 %vm867_vm2, %v3107_v19 }
 0x1d1   : > { %v3113_v24 = vmul.f32 0.35355338, %v690_v22  ;;  %2162 = vmatprep.subr.mxu1 %v2683_v1  ;;  %v2062_v22 = vld [vmem:[%s3359_s1] ss:$0 sm:$0xff]  ;;  %s3227_s1 = scalar_lea.hbm %s3364_s28, %s2082_s25 }
 0x1d3   : > { %2160 = vmatmul.mubr.msk.f32.vlgmr.msra.gmra.mrb[2].mxu1 %vm867_vm2, %v3113_v24 }
 0x1d4   : > { %1103 = vrot.lane.b32.xlu1 %v3113_v24, %s2684_s30  ;;  %2164 = vmatprep.mubr.msk.f32.mxu1 %vm2682_vm0, %v2683_v1 }
 0x1d6   : > { %v855_v43 = vpop.f32.mrb[2].mxu0 }
 0x1d7   : > { %v3134_v44 = vadd.f32 %v2060_v42, %v855_v43  ;;  %v2156_v45 = vpop.f32.mrb[3].mxu0 }
 0x1d9   : > { %2163 = vmatpush3.msra.mxu1 %v3134_v44 }
 0x1da   : > { %2172 = vmatprep.subr.mxu1 %v2683_v1 }
 0x242   : > { %v1106_v48 = vpop.permute.xlu1 %1105 }
 0x246   : > { %v1104_v50 = vpop.permute.xlu1 %1103 }
 0x2a6   : > { %v940_v33 = vpop.f32.mrb[2].mxu1 }
 0x2a7   : > { %v941_v34 = vadd.f32 %v940_v33, %v3129_v32  ;;  %v2161_v35 = vpop.f32.mrb[3].mxu1  ;;  %v1509_v33 = vld [vmem:[%s3358_s21 + $0x10] sm:$0xff] }
 0x2a9   : > { %v944_v36 = vsel %vm867_vm2, %v941_v34, -inf }
 0x2aa   : > { %945 = vmax.xlane.f32.xlu0 %v944_v36 }
 0x337   : > { %v946_v37 = vpop.xlane.xlu0 %945 }
 0x338   : > { %v947_v38 = vsub.f32 %v941_v34, %v946_v37 }
 0x33a   : > { %v948_v39 = vmul.f32 1.442695, %v947_v38 }
 0x33c   : > { %2356 = vpow2.f32 %v948_v39 }
 0x346   : > { %v2357_v40 = vpop.eup %2356 }
 0x347   : > { %v950_v41 = vsel %vm867_vm2, %v2357_v40, 0.0 }
 0x348   : > { %951 = vadd.xlane.f32.xlu0 %v950_v41 }
 0x3d5   : > { %v952_v46 = vpop.xlane.xlu0 %951 }
 0x3d6   : > { %2358 = vrcp.f32 %v952_v46 }
 0x3e0   : > { %v2359_v47 = vpop.eup %2358 }
 0x3e1   : > { %v954_v49 = vmul.f32 %v2359_v47, %v2357_v40 }
 0x3e3   : > { %2165 = vmatmul.mubr.msk.f32.vlgmr.msra.gmra.mrb[4].mxu1 %vm867_vm2, %v954_v49 }
 0x3e4   : > { %2173 = vmatpush3.xpose.msk.msra.mxu1 %vm867_vm2, %v1106_v48  ;;  %2174 = vmatprep.mubr.msk.f32.mxu1 %vm2682_vm0, %v2683_v1 }
 0x3e5   : > { %2182 = vmatprep.subr.mxu1 %v2683_v1 }
 0x3e7   : > { %2175 = vmatmul.mubr.msk.f32.vlgmr.msra.gmra.mrb[6].mxu1 %vm867_vm2, %v1104_v50 }
 0x3e8   : > { %2184 = vmatprep.mubr.msk.f32.mxu1 %vm2682_vm0, %v2683_v1  ;;  %2183 = vmatpush3.msra.mxu1 %v1269_v0 }
 0x3e9   : > { %2192 = vmatprep.subr.mxu1 %v2683_v1 }
 0x4b6   : > { %v1024_v52 = vpop.f32.mrb[4].mxu1 }
 0x4b7   : > { %v2166_v53 = vpop.f32.mrb[5].mxu1  ;;  %2170 = vmatmul.mubr.msk.f32.vlgmr.msra.gmra.mrb[4].mxu0 %vm867_vm2, %v1024_v52 }
 0x4b8   : > { %2179 = vmatprep.mubr.msk.f32.mxu0 %vm2682_vm0, %v2683_v1 }
 0x4ba   : > { %v1177_v54 = vpop.f32.mrb[6].mxu1 }
 0x4bb   : > { %v1178_v55 = vadd.f32 %v1177_v54, %v3129_v32  ;;  %v2176_v56 = vpop.f32.mrb[7].mxu1 }
 0x4bd   : > { %v1181_v57 = vsel %vm867_vm2, %v1178_v55, -inf }
 0x4be   : > { %1182 = vmax.xlane.f32.xlu0 %v1181_v57 }
 0x4d4   : > { %1193 = vrot.lane.b32.xlu0 %v3134_v44, %s2684_s30 }
 0x4d8   : > { %1346 = vrot.lane.b32.xlu0 %v3107_v19, %s2685_s17 }
 0x4dc   : > { %1344 = vrot.lane.b32.xlu0 %v3113_v24, %s2685_s17 }
 0x54b   : > { %v1183_v58 = vpop.xlane.xlu0 %1182 }
 0x54c   : > { %v1184_v59 = vsub.f32 %v1178_v55, %v1183_v58 }
 0x54e   : > { %v1185_v60 = vmul.f32 1.442695, %v1184_v59 }
 0x54f   : > { %v1194_v61 = vpop.permute.xlu0 %1193 }
 0x550   : > { %2360 = vpow2.f32 %v1185_v60  ;;  %2178 = vmatpush3.msra.mxu0 %v1194_v61 }
 0x551   : > { %2187 = vmatprep.subr.mxu0 %v2683_v1 }
 0x553   : > { %v1347_v6 = vpop.permute.xlu0 %1346 }
 0x557   : > { %v1345_v8 = vpop.permute.xlu0 %1344 }
 0x55a   : > { %v2361_v62 = vpop.eup %2360 }
 0x55b   : > { %v1187_v63 = vsel %vm867_vm2, %v2361_v62, 0.0 }
 0x55c   : > { %1188 = vadd.xlane.f32.xlu1 %v1187_v63 }
 0x56d   : > { %1433 = vrot.lane.b32.xlu1 %v3134_v44, %s2685_s17  ;;  %s602_s17 = scalar_lea.vmem [#allocation14], %s3060_s10  ;;  %s2687_s10 = smov [#allocation14]  }
 0x56e   : > { %s2580_s15 = sshll.u32 %s2687_s10, 4  ;;  %s2581_s15 = int_to_ptr.vmem [resolvable:$false] %s2580_s15 }
 0x56f   : > { %s2582_s22 = scalar_lea.vmem %s2581_s15, 256 }
 0x571   : > { %1586 = vrot.lane.b32.xlu1 %v3107_v19, %s2686_s9 }
 0x58a   : > { %v1098_v2 = vpop.f32.mrb[4].mxu0 }
 0x58b   : > { %v2171_v3 = vpop.f32.mrb[5].mxu0  ;;  %v1102_v23 = vadd.f32 %v2062_v22, %v1098_v2 }
 0x5e9   : > { %v1189_v4 = vpop.xlane.xlu1 %1188 }
 0x5ea   : > { %2362 = vrcp.f32 %v1189_v4 }
 0x5ed   : > { %v1434_v10 = vpop.permute.xlu1 %1433 }
 0x5f1   : > { %v1587_v28 = vpop.permute.xlu1 %1586 }
 0x5f4   : > { %v2363_v5 = vpop.eup %2362 }
 0x5f5   : > { %v1191_v7 = vmul.f32 %v2363_v5, %v2361_v62  ;;  %v2080_v5 = vld [vmem:[%s3363_s3] ss:$0 sm:$0xff] }
 0x5f7   : > { %2180 = vmatmul.mubr.msk.f32.vlgmr.msra.gmra.mrb[6].mxu0 %vm867_vm2, %v1191_v7 }
 0x5f8   : > { %2188 = vmatpush3.xpose.msk.msra.mxu0 %vm867_vm2, %v1347_v6  ;;  %2189 = vmatprep.mubr.msk.f32.mxu0 %vm2682_vm0, %v2683_v1 }
 0x5f9   : > { %2197 = vmatprep.subr.mxu0 %v2683_v1 }
 0x5fb   : > { %2190 = vmatmul.mubr.msk.f32.vlgmr.msra.gmra.mrb[8].mxu0 %vm867_vm2, %v1345_v8 }
 0x5fc   : > { %2199 = vmatprep.mubr.msk.f32.mxu0 %vm2682_vm0, %v2683_v1  ;;  %2198 = vmatpush3.msra.mxu0 %v1509_v33 }
 0x5fd   : > { %2207 = vmatprep.subr.mxu0 %v2683_v1 }
 0x6ca   : > { %v1265_v9 = vpop.f32.mrb[6].mxu0 }
 0x6cb   : > { %v2181_v11 = vpop.f32.mrb[7].mxu0  ;;  %2185 = vmatmul.mubr.msk.f32.vlgmr.msra.gmra.mrb[8].mxu1 %vm867_vm2, %v1265_v9 }
 0x6cc   : > { %2193 = vmatpush3.msra.mxu1 %v1434_v10  ;;  %2194 = vmatprep.mubr.msk.f32.mxu1 %vm2682_vm0, %v2683_v1 }
 0x6cd   : > { %2202 = vmatprep.subr.mxu1 %v2683_v1 }
 0x6ce   : > { %v1418_v12 = vpop.f32.mrb[8].mxu0 }
 0x6cf   : > { %v1419_v13 = vadd.f32 %v1418_v12, %v3129_v32  ;;  %v2191_v14 = vpop.f32.mrb[9].mxu0 }
 0x6d1   : > { %v1422_v16 = vsel %vm867_vm2, %v1419_v13, -inf }
 0x6d2   : > { %1423 = vmax.xlane.f32.xlu0 %v1422_v16 }
 0x75f   : > { %v1424_v17 = vpop.xlane.xlu0 %1423 }
 0x760   : > { %v1425_v18 = vsub.f32 %v1419_v13, %v1424_v17 }
 0x762   : > { %v1426_v19 = vmul.f32 1.442695, %v1425_v18 }
 0x764   : > { %2364 = vpow2.f32 %v1426_v19 }
 0x76e   : > { %v2365_v20 = vpop.eup %2364 }
 0x76f   : > { %v1428_v21 = vsel %vm867_vm2, %v2365_v20, 0.0 }
 0x770   : > { %1429 = vadd.xlane.f32.xlu1 %v1428_v21 }
 0x781   : > { %1584 = vrot.lane.b32.xlu1 %v3113_v24, %s2686_s9 }
 0x79e   : > { %v1339_v25 = vpop.f32.mrb[8].mxu1 }
 0x79f   : > { %v1343_v26 = vadd.f32 %v1339_v25, %v1102_v23  ;;  %v2186_v27 = vpop.f32.mrb[9].mxu1 }
 0x7fd   : > { %v1430_v29 = vpop.xlane.xlu1 %1429 }
 0x7fe   : > { %2366 = vrcp.f32 %v1430_v29 }
 0x801   : > { %v1585_v24 = vpop.permute.xlu1 %1584 }
 0x808   : > { %v2367_v30 = vpop.eup %2366 }
 0x809   : > { %v1432_v31 = vmul.f32 %v2367_v30, %v2365_v20 }
 0x80b   : > { %2195 = vmatmul.mubr.msk.f32.vlgmr.msra.gmra.mrb[10].mxu1 %vm867_vm2, %v1432_v31 }
 0x80c   : > { %2203 = vmatpush3.xpose.msk.msra.mxu1 %vm867_vm2, %v1587_v28  ;;  %2204 = vmatprep.mubr.msk.f32.mxu1 %vm2682_vm0, %v2683_v1 }
 0x80d   : > { %2212 = vmatprep.subr.mxu1 %v2683_v1 }
 0x80f   : > { %2205 = vmatmul.mubr.msk.f32.vlgmr.msra.gmra.mrb[12].mxu1 %vm867_vm2, %v1585_v24 }
 0x810   : > { %2214 = vmatprep.mubr.msk.f32.mxu1 %vm2682_vm0, %v2683_v1 }
 0x8de   : > { %v1505_v34 = vpop.f32.mrb[10].mxu1 }
 0x8df   : > { %v2196_v35 = vpop.f32.mrb[11].mxu1  ;;  %2200 = vmatmul.mubr.msk.f32.vlgmr.msra.gmra.mrb[10].mxu0 %vm867_vm2, %v1505_v34 }
 0x8e0   : > { %2209 = vmatprep.mubr.msk.f32.mxu0 %vm2682_vm0, %v2683_v1  ;;  %v1749_v1 = vld [vmem:[%s3358_s21 + $0x18] sm:$0xff] }
 0x8e1   : > { %2213 = vmatpush3.msra.mxu1 %v1749_v1 }
 0x8e2   : > { %v1658_v36 = vpop.f32.mrb[12].mxu1 }
 0x8e3   : > { %v1659_v37 = vadd.f32 %v1658_v36, %v3129_v32  ;;  %v2206_v38 = vpop.f32.mrb[13].mxu1 }
 0x8e5   : > { %v1662_v39 = vsel %vm867_vm2, %v1659_v37, -inf }
 0x8e6   : > { %1663 = vmax.xlane.f32.xlu0 %v1662_v39 }
 0x8fc   : > { %1673 = vrot.lane.b32.xlu0 %v3134_v44, %s2686_s9  ;;  %s1871_s9 = sshll.u32 %s602_s17, 4  ;;  %s3229_s9 = int_to_ptr.vmem [resolvable:$true] %s1871_s9 }
 0x8fd   : > { %s2576_s7 = scalar_lea.vmem %s3229_s9, 128  ;;  %p2583_p8 = scmp.lt.s32.totalorder %s3229_s9, %s2581_s15 }
 0x8fe   : > { %p2577_p13 = scmp.ne.s32.totalorder %s3229_s9, %s2576_s7  ;;  %p2584_p9 = scmp.lt.s32.totalorder %s2582_s22, %s2576_s7 }
 0x900   : > { %p2578_p1 = pnand %p2577_p13, %p3366_p2  ;;  %p2585_p7 = por %p2584_p9, %p2583_p8 }
 0x902   : > { %p2579_p12 = pneg %p2578_p1 }
 0x904   : > { %p2586_p11 = pnand %p2585_p7, %p2579_p12 }
 0x973   : > { %v1664_v40 = vpop.xlane.xlu0 %1663 }
 0x974   : > { %v1665_v41 = vsub.f32 %v1659_v37, %v1664_v40 }
 0x976   : > { %v1666_v42 = vmul.f32 1.442695, %v1665_v41 }
 0x977   : > { %v1674_v43 = vpop.permute.xlu0 %1673 }
 0x978   : > { %2368 = vpow2.f32 %v1666_v42  ;;  %2208 = vmatpush3.msra.mxu0 %v1674_v43 }
 0x982   : > { %v2369_v45 = vpop.eup %2368 }
 0x983   : > { %v1668_v46 = vsel %vm867_vm2, %v2369_v45, 0.0 }
 0x984   : > { %1669 = vadd.xlane.f32.xlu1 %v1668_v46 }
 0x9b2   : > { %v1579_v32 = vpop.f32.mrb[10].mxu0 }
 0x9b3   : > { %v1583_v47 = vadd.f32 %v1579_v32, %v1343_v26  ;;  %v2201_v48 = vpop.f32.mrb[11].mxu0 }
 0xa11   : > { %v1670_v49 = vpop.xlane.xlu1 %1669 }
 0xa12   : > { %2370 = vrcp.f32 %v1670_v49 }
 0xa1c   : > { %v2371_v44 = vpop.eup %2370 }
 0xa1d   : > { %v1672_v50 = vmul.f32 %v2371_v44, %v2369_v45 }
 0xa1f   : > { %2210 = vmatmul.mubr.msk.f32.vlgmr.msra.gmra.mrb[12].mxu0 %vm867_vm2, %v1672_v50 }
 0xaf2   : > { %v1745_v51 = vpop.f32.mrb[12].mxu0 }
 0xaf3   : > { %v2211_v52 = vpop.f32.mrb[13].mxu0  ;;  %2215 = vmatmul.mubr.msk.f32.vlgmr.msra.gmra.mrb[14].mxu1 %vm867_vm2, %v1745_v51 }
 0xbc6   : > { %v1819_v53 = vpop.f32.mrb[14].mxu1 }
 0xbc7   : > { %v1823_v54 = vadd.f32 %v1819_v53, %v1583_v47  ;;  %v2216_v55 = vpop.f32.mrb[15].mxu1 }
 0xbc9   : > { %v1824_v56 = vadd.f32 %v1823_v54, %v3091_v15  ;;  %v2079_v15 = vld [vmem:[%s3362_s12] ss:$0 sm:$0xff] }
 0xbcb   : > { %v1825_v57 = vsel %vm619_vm1, %v1824_v56, 0.0 }
 0xbcc   : > { %1826 = vadd.xlane.f32.xlu0 %v1825_v57 }
 0xc59   : > { %v1827_v58 = vpop.xlane.xlu0 %1826 }
 0xc5a   : > { %v1829_v59 = vmul.f32 0.03125, %v1827_v58 }
 0xc5c   : > { %v1830_v60 = vsub.f32 %v1824_v56, %v1829_v59 }
 0xc5e   : > { %v1831_v61 = vmul.f32 %v1830_v60, %v1830_v60 }
 0xc60   : > { %v1832_v62 = vsel %vm619_vm1, %v1831_v61, 0.0 }
 0xc61   : > { %1833 = vadd.xlane.f32.xlu1 %v1832_v62 }
 0xcee   : > { %v1834_v63 = vpop.xlane.xlu1 %1833 }
 0xcef   : > { %v1835_v0 = vmul.f32 0.03125, %v1834_v63 }
 0xcf1   : > { %v1836_v2 = vadd.f32 1e-05, %v1835_v0 }
 0xcf3   : > { %2372 = vrsqrt.f32 %v1836_v2 }
 0xcfd   : > { %v2373_v3 = vpop.eup %2372 }
 0xcfe   : > { %v1838_v4 = vmul.f32 %v2373_v3, %v1830_v60 }
 0xd00   : > { %v1846_v6 = vmul.f32 %v2079_v15, %v1838_v4 }
 0xd02   : > { %v1854_v7 = vadd.f32 %v2080_v5, %v1846_v6 }
 0xd04   : > { %1855 = vst.msk [vmem:[%s602_s17] sm:$0xff] %vm619_vm1, %v1854_v7 }
 0xd05   : > { %2589 = shalt.err (!%p2586_p11)
}
 0xd06   : > { %s2590_s29 = scalar_lea.hbm %s3227_s1, 128  ;;  %s2594_s16 = scalar_lea.hbm %s3365_s18, 256 }
 0xd07   : > { %p2591_p5 = scmp.ne.s32.totalorder %s3227_s1, %s2590_s29  ;;  %p2595_p0 = scmp.lt.u32.totalorder %s3227_s1, %s3365_s18 }
 0xd08   : > { %p2596_p4 = scmp.lt.u32.totalorder %s2594_s16, %s2590_s29  ;;  %p2598_p13 = scmp.lt.u32.totalorder %s2590_s29, %s3227_s1 }
 0xd09   : > { %p2592_p3 = pnand %p2591_p5, %p3366_p2 }
 0xd0a   : > { %p2597_p10 = por %p2596_p4, %p2595_p0 }
 0xd0b   : > { %p2593_p6 = pneg %p2592_p3 }
 0xd0c   : > { %p2599_p1 = por %p2598_p13, %p2597_p10 }
 0xd0e   : > { %p2600_p12 = pnand %p2599_p1, %p2593_p6 }
 0xd10   : > { %2603 = shalt.err (!%p2600_p12)
}
 0xd11   : > { %2257 = dma.vmem_to_hbm [thread:$0]  (%p3366_p2), %s3229_s9, 128, %s3227_s1, %s1857_s19  }
 0xd12 PF: > { %s3367_s30 = sld [smem:[#allocation20_spill]]  ;;  %s3368_s3 = sld [smem:[#allocation27_spill]] }
 0xd13   : > { %s3369_s25 = sld [smem:[#allocation23_spill]] }
 0xd18   : > { %s1883_s17 = sand.u32 1, %s3367_s30   ;;  %p3370_p8 = scmp.ne.s32.totalorder %s3368_s3, 0 }
 0xd19   : > { %p3371_p9 = scmp.ge.s32.totalorder %s3369_s25, 2  ;;  %s1884_s13 = scalar_lea.sflag [#allocation4], %s1883_s17 }
 0xd1b   : > { %p2283_p7 = pnand %p3371_p9, %p3370_p8 }
 0xd1d   : > { %2645 = dma.done.wait (!%p2283_p7), %s1884_s13, 128  }
 0xd1e   : > { %2647 = vsyncadd (!%p2283_p7), %s1884_s13, 4294967168  ;;  %s34_s30 = sadd.s32 1, %s3369_s25   ;;  %s3372_s11 = sld [smem:[#allocation26_spill]] }
 0xd1f   : > { %p31_p11 = scmp.ge.s32.totalorder %s34_s30, 4   ;;  %s3373_s28 = sld [smem:[#allocation22_spill]] }
 0xd20   : > { %s3374_s29 = sld [smem:[#allocation24_spill]]  ;;  %s3375_s25 = smov %s2654_s26 }
 0xd21   : > { %s3376_s26 = smov %s2658_s27  ;;  %33 = sbr.rel (!%p31_p11) target bundleno = 19 (0x13), region = 157 }
 0xd24   : > { %s3377_s27 = smov %s3372_s11 }
 0xd28   :  { %1889 = vsyncpa [#allocation3], 1 }
 0xd29   :  { %1891 = vsyncpa [#allocation3 + $0x1], 1 }
 0xd2a   :  { %1892 = vsyncpa [#allocation6], 1 }
 0xd2b   :  { %1894 = vsyncpa [#allocation6 + $0x1], 1 }
 0xd2c   :  { %1895 = vsyncpa [#allocation9], 1 }
 0xd2d   :  { %1896 = vsyncpa [#allocation12], 1 }
 0xd2e   :  { %1897 = vsyncpa [#allocation4], 1 }
 0xd2f   :  { %1899 = vsyncpa [#allocation4 + $0x1], 1 }

</bundles_post_ra>
